<compile_context>
chip_gen: v5e
topology: v5e:2x2
jax: 0.10.0
libtpu: 0.0.40
codegen_flags: <defaults>
</compile_context>

<pallas_src>
import functools
import math

import jax
import jax.numpy as jnp
from jax.experimental import pallas as pl
from jax.experimental.pallas import tpu as pltpu


def _gcn_kernel(eps, inv_d, x_ref, edge_ref, w1_ref, b1_ref, w2_ref, b2_ref,
                gamma_ref, beta_ref, o_ref, h1_ref):
    """One (batch, row-tile) grid step.

    x_ref    : (1, L, D)  f32   full node embeddings of this batch element
    edge_ref : (1, tl, L) bf16  adjacency rows of this tile
    w1/w2    : (D, D)     bf16  pre-transposed [in, out]
    b1/b2/gamma/beta : (1, D) f32
    o_ref    : (1, tl, D) f32
    h1_ref   : (L, D)     bf16  VMEM scratch: fc1 output for this batch element
    """
    f32 = jnp.float32
    bf16 = jnp.bfloat16
    r = pl.program_id(1)
    tl = o_ref.shape[1]

    # fc1 over the full batch element, computed once per batch (row tile 0).
    @pl.when(r == 0)
    def _():
        h1 = jnp.dot(x_ref[0].astype(bf16), w1_ref[...],
                     preferred_element_type=f32) + b1_ref[0]
        h1_ref[...] = h1.astype(bf16)

    # Graph aggregation for this row tile: (tl, L) @ (L, D), bf16 in / f32 acc.
    agg = jnp.dot(edge_ref[0], h1_ref[...], preferred_element_type=f32)

    # fc2 (bf16 MXU inputs, f32 accumulation).
    h2 = jnp.dot(agg.astype(bf16), w2_ref[...],
                 preferred_element_type=f32) + b2_ref[0]

    # Residual (dropout == identity in eval mode) + LayerNorm over D, all f32.
    start = r * tl
    if tl % 8 == 0:
        start = pl.multiple_of(start, 8)
    x_tile = x_ref[0, pl.ds(start, tl), :]                 # (tl, D) f32
    resid = h2 + x_tile
    s = jnp.sum(resid, axis=-1, keepdims=True)
    sq = jnp.sum(resid * resid, axis=-1, keepdims=True)
    mean = s * inv_d
    var = sq * inv_d - mean * mean                         # fused one-pass stats
    normed = (resid - mean) * jax.lax.rsqrt(var + eps)
    o_ref[0] = (normed * gamma_ref[0] + beta_ref[0]).astype(o_ref.dtype)


def _pick_row_tile(L):
    """Largest 'nice' row tile (multiple of 8) that divides L; prefer 128."""
    if L % 8 != 0:
        return L
    for cand in (128, 256, 64, 32, 16, 8):
        if cand <= L and L % cand == 0:
            return cand
    return L


def gcn_forward(graph_em, edge, params, code_len, sub_token_len, ast_change_len,
                eps=1e-5):
    B, L, D = graph_em.shape
    assert L == code_len + sub_token_len + ast_change_len

    # One-time wrapper prep: PyTorch [out, in] weights -> [in, out] bf16 so the
    # kernel feeds the MXU directly (no in-kernel transpose, half the resident
    # weight bytes).  Adjacency stays narrow (bf16 is exact for 0/1 values).
    w1t = params["w1"].T.astype(jnp.bfloat16)
    w2t = params["w2"].T.astype(jnp.bfloat16)
    edge_bf = edge if edge.dtype == jnp.bfloat16 else edge.astype(jnp.bfloat16)
    x = graph_em.astype(jnp.float32)

    tl = _pick_row_tile(L)
    rt = L // tl

    kernel = functools.partial(_gcn_kernel, eps, 1.0 / D)

    # Rough per-step VMEM footprint: double-buffered blocks + resident weights
    # and fc1 scratch.  Capped at 32 MiB so it is safe on v7x's 64 MiB VMEM.
    est = (2 * (L * D * 4 + tl * L * 2 + tl * D * 4)        # x, edge, out blocks
           + 2 * (2 * D * D * 2 + 4 * D * 4)                # weights + vectors
           + L * D * 2)                                     # fc1 scratch (bf16)
    vmem_limit = min(max(2 * est, 16 << 20), 32 << 20)

    res = pl.pallas_call(
        kernel,
        out_shape=jax.ShapeDtypeStruct((B, L, D), jnp.float32),
        grid=(B, rt),
        in_specs=[
            pl.BlockSpec((1, L, D), lambda b, r: (b, 0, 0)),    # graph_em
            pl.BlockSpec((1, tl, L), lambda b, r: (b, r, 0)),   # edge row tile
            pl.BlockSpec((D, D), lambda b, r: (0, 0)),          # W1^T (resident)
            pl.BlockSpec((1, D), lambda b, r: (0, 0)),          # b1
            pl.BlockSpec((D, D), lambda b, r: (0, 0)),          # W2^T (resident)
            pl.BlockSpec((1, D), lambda b, r: (0, 0)),          # b2
            pl.BlockSpec((1, D), lambda b, r: (0, 0)),          # gamma
            pl.BlockSpec((1, D), lambda b, r: (0, 0)),          # beta
        ],
        out_specs=pl.BlockSpec((1, tl, D), lambda b, r: (b, r, 0)),
        scratch_shapes=[pltpu.VMEM((L, D), jnp.bfloat16)],      # fc1 activations
        compiler_params=pltpu.CompilerParams(
            dimension_semantics=("parallel", "arbitrary"),
            vmem_limit_bytes=vmem_limit),
    )(x, edge_bf, w1t, params["b1"], w2t, params["b2"],
      params["gamma"], params["beta"])

    # The module returns three sequence-axis views; splitting stays outside the
    # kernel so the kernel output store remains one dense, tile-aligned slab.
    return (res[:, :code_len],
            res[:, code_len:code_len + sub_token_len],
            res[:, code_len + sub_token_len:])


def gcn_reference(graph_em, edge, params, eps=1e-5):
    """Pure-JAX f32 reference of the PyTorch module (for verification)."""
    h = graph_em @ params["w1"].T + params["b1"]
    h = jnp.einsum('bij,bjd->bid', edge.astype(jnp.float32), h)
    h = h @ params["w2"].T + params["b2"]
    resid = h + graph_em
    mean = resid.mean(-1, keepdims=True)
    var = ((resid - mean) ** 2).mean(-1, keepdims=True)
    return (resid - mean) / jnp.sqrt(var + eps) * params["gamma"] + params["beta"]


def init_params(key, dmodel):
    ks = jax.random.split(key, 4)
    bound = 1.0 / math.sqrt(dmodel)

    def lin(kw, kb):
        w = jax.random.uniform(kw, (dmodel, dmodel), jnp.float32, -bound, bound)
        b = jax.random.uniform(kb, (1, dmodel), jnp.float32, -bound, bound)
        return w, b

    w1, b1 = lin(ks[0], ks[1])
    w2, b2 = lin(ks[2], ks[3])
    return dict(w1=w1, b1=b1, w2=w2, b2=b2,
                gamma=jnp.ones((1, dmodel), jnp.float32),
                beta=jnp.zeros((1, dmodel), jnp.float32))


if __name__ == "__main__":
    import numpy as np

    B, D = 2, 128
    code_len, sub_token_len, ast_change_len = 128, 64, 64
    L = code_len + sub_token_len + ast_change_len            # 256

    root = jax.random.PRNGKey(0)
    k_params, k_x, k_e = jax.random.split(root, 3)

    params = init_params(k_params, D)
    graph_em = jax.random.normal(k_x, (B, L, D), jnp.float32)
    # 0/1 adjacency, kept narrow (bf16 is exact for 0/1) end-to-end.
    edge = (jax.random.uniform(k_e, (B, L, L)) > 0.5).astype(jnp.bfloat16)

    code_part, sub_part, ast_part = gcn_forward(
        graph_em, edge, params, code_len, sub_token_len, ast_change_len)
    jax.block_until_ready((code_part, sub_part, ast_part))

    assert code_part.shape == (B, code_len, D)
    assert sub_part.shape == (B, sub_token_len, D)
    assert ast_part.shape == (B, ast_change_len, D)

    # Loose tolerance: kernel uses bf16 MXU inputs with f32 accumulation,
    # reference is pure f32.
    ref = gcn_reference(graph_em, edge, params)
    got = jnp.concatenate([code_part, sub_part, ast_part], axis=1)
    np.testing.assert_allclose(np.asarray(got), np.asarray(ref),
                               atol=1e-1, rtol=0)
    print("KERNEL_OK")
</pallas_src>

<mosaic_0001>
module attributes {stable_mosaic.version = 11 : i64} {
  func.func @_gcn_kernel(%arg0: i32, %arg1: i32, %arg2: memref<1x256x128xf32, #tpu.memory_space<vmem>>, %arg3: memref<1x128x256xbf16, #tpu.memory_space<vmem>>, %arg4: memref<128x128xbf16, #tpu.memory_space<vmem>>, %arg5: memref<1x128xf32, #tpu.memory_space<vmem>>, %arg6: memref<128x128xbf16, #tpu.memory_space<vmem>>, %arg7: memref<1x128xf32, #tpu.memory_space<vmem>>, %arg8: memref<1x128xf32, #tpu.memory_space<vmem>>, %arg9: memref<1x128xf32, #tpu.memory_space<vmem>>, %arg10: memref<1x128x128xf32, #tpu.memory_space<vmem>>, %arg11: memref<256x128xbf16, #tpu.memory_space<vmem>>) attributes {dimension_semantics = [#tpu.dimension_semantics<parallel>, #tpu.dimension_semantics<arbitrary>], iteration_bounds = array<i64: 2, 2>, scalar_prefetch = 0 : i64, scratch_operands = 1 : i64, tpu.core_type = #tpu.core_type<tc>, window_params = [{transform_indices = @transform_0, window_bounds = array<i64: 1, 256, 128>}, {transform_indices = @transform_1, window_bounds = array<i64: 1, 128, 256>}, {pipeline_mode = #tpu.pipeline_mode<synchronous>, transform_indices = @transform_2, window_bounds = array<i64: 128, 128>}, {pipeline_mode = #tpu.pipeline_mode<synchronous>, transform_indices = @transform_3, window_bounds = array<i64: 1, 128>}, {pipeline_mode = #tpu.pipeline_mode<synchronous>, transform_indices = @transform_4, window_bounds = array<i64: 128, 128>}, {pipeline_mode = #tpu.pipeline_mode<synchronous>, transform_indices = @transform_5, window_bounds = array<i64: 1, 128>}, {pipeline_mode = #tpu.pipeline_mode<synchronous>, transform_indices = @transform_6, window_bounds = array<i64: 1, 128>}, {pipeline_mode = #tpu.pipeline_mode<synchronous>, transform_indices = @transform_7, window_bounds = array<i64: 1, 128>}, {transform_indices = @transform_8, window_bounds = array<i64: 1, 128, 128>}]} {
    %c0_i32 = arith.constant 0 : i32
    %0 = arith.cmpi eq, %arg1, %c0_i32 : i32
    %1 = arith.extui %0 : i1 to i32
    %c0_i32_0 = arith.constant 0 : i32
    %2 = arith.cmpi ne, %1, %c0_i32_0 : i32
    scf.if %2 {
      %c0_24 = arith.constant 0 : index
      %c0_25 = arith.constant 0 : index
      %c0_26 = arith.constant 0 : index
      %52 = vector.load %arg2[%c0_24, %c0_25, %c0_26] : memref<1x256x128xf32, #tpu.memory_space<vmem>>, vector<1x256x128xf32>
      %53 = vector.shape_cast %52 : vector<1x256x128xf32> to vector<256x128xf32>
      %54 = arith.truncf %53 : vector<256x128xf32> to vector<256x128xbf16>
      %c0_27 = arith.constant 0 : index
      %c0_28 = arith.constant 0 : index
      %55 = vector.load %arg4[%c0_27, %c0_28] : memref<128x128xbf16, #tpu.memory_space<vmem>>, vector<128x128xbf16>
      %cst_29 = arith.constant dense<0.000000e+00> : vector<256x128xf32>
      %56 = tpu.matmul %54, %55, %cst_29 {dimension_numbers = #tpu.dot_dimension_numbers<[1], [0], [0], [1], [0, 0, 1, 1], [], []>} : vector<256x128xbf16>, vector<128x128xbf16>, vector<256x128xf32> -> vector<256x128xf32>
      %c0_30 = arith.constant 0 : index
      %c0_31 = arith.constant 0 : index
      %57 = vector.load %arg5[%c0_30, %c0_31] : memref<1x128xf32, #tpu.memory_space<vmem>>, vector<1x128xf32>
      %58 = vector.shape_cast %57 : vector<1x128xf32> to vector<128xf32>
      %59 = vector.shape_cast %58 : vector<128xf32> to vector<1x128xf32>
      %60 = vector.broadcast %59 : vector<1x128xf32> to vector<256x128xf32>
      %61 = arith.addf %56, %60 : vector<256x128xf32>
      %62 = arith.truncf %61 : vector<256x128xf32> to vector<256x128xbf16>
      %c0_32 = arith.constant 0 : index
      %c0_33 = arith.constant 0 : index
      %63 = vector.load %arg11[%c0_32, %c0_33] : memref<256x128xbf16, #tpu.memory_space<vmem>>, vector<256x128xbf16>
      tpu.vector_store %arg11[%c0_32, %c0_33], %62 {strides = array<i32>} : memref<256x128xbf16, #tpu.memory_space<vmem>>, vector<256x128xbf16>,
    } else {
    }
    %c0 = arith.constant 0 : index
    %c0_1 = arith.constant 0 : index
    %c0_2 = arith.constant 0 : index
    %3 = vector.load %arg3[%c0, %c0_1, %c0_2] : memref<1x128x256xbf16, #tpu.memory_space<vmem>>, vector<1x128x256xbf16>
    %4 = vector.shape_cast %3 : vector<1x128x256xbf16> to vector<128x256xbf16>
    %c0_3 = arith.constant 0 : index
    %c0_4 = arith.constant 0 : index
    %5 = vector.load %arg11[%c0_3, %c0_4] : memref<256x128xbf16, #tpu.memory_space<vmem>>, vector<256x128xbf16>
    %cst = arith.constant dense<0.000000e+00> : vector<128x128xf32>
    %6 = tpu.matmul %4, %5, %cst {dimension_numbers = #tpu.dot_dimension_numbers<[1], [0], [0], [1], [0, 0, 1, 1], [], []>} : vector<128x256xbf16>, vector<256x128xbf16>, vector<128x128xf32> -> vector<128x128xf32>
    %7 = arith.truncf %6 : vector<128x128xf32> to vector<128x128xbf16>
    %c0_5 = arith.constant 0 : index
    %c0_6 = arith.constant 0 : index
    %8 = vector.load %arg6[%c0_5, %c0_6] : memref<128x128xbf16, #tpu.memory_space<vmem>>, vector<128x128xbf16>
    %cst_7 = arith.constant dense<0.000000e+00> : vector<128x128xf32>
    %9 = tpu.matmul %7, %8, %cst_7 {dimension_numbers = #tpu.dot_dimension_numbers<[1], [0], [0], [1], [0, 0, 1, 1], [], []>} : vector<128x128xbf16>, vector<128x128xbf16>, vector<128x128xf32> -> vector<128x128xf32>
    %c0_8 = arith.constant 0 : index
    %c0_9 = arith.constant 0 : index
    %10 = vector.load %arg7[%c0_8, %c0_9] : memref<1x128xf32, #tpu.memory_space<vmem>>, vector<1x128xf32>
    %11 = vector.shape_cast %10 : vector<1x128xf32> to vector<128xf32>
    %12 = vector.shape_cast %11 : vector<128xf32> to vector<1x128xf32>
    %13 = vector.broadcast %12 : vector<1x128xf32> to vector<128x128xf32>
    %14 = arith.addf %9, %13 : vector<128x128xf32>
    %c128_i32 = arith.constant 128 : i32
    %15 = arith.muli %arg1, %c128_i32 : i32
    %16 = tpu.assume_multiple %15, 8 : i32
    %c0_10 = arith.constant 0 : index
    %17 = arith.index_cast %16 : i32 to index
    %c0_11 = arith.constant 0 : index
    %18 = vector.load %arg2[%c0_10, %17, %c0_11] : memref<1x256x128xf32, #tpu.memory_space<vmem>>, vector<1x128x128xf32>
    %19 = vector.shape_cast %18 : vector<1x128x128xf32> to vector<128x128xf32>
    %20 = arith.addf %14, %19 : vector<128x128xf32>
    %cst_12 = arith.constant dense<0.000000e+00> : vector<128xf32>
    %21 = vector.multi_reduction <add>, %20, %cst_12 [1] : vector<128x128xf32> to vector<128xf32>
    %22 = vector.shape_cast %21 : vector<128xf32> to vector<128x1xf32>
    %23 = arith.mulf %20, %20 : vector<128x128xf32>
    %cst_13 = arith.constant dense<0.000000e+00> : vector<128xf32>
    %24 = vector.multi_reduction <add>, %23, %cst_13 [1] : vector<128x128xf32> to vector<128xf32>
    %25 = vector.shape_cast %24 : vector<128xf32> to vector<128x1xf32>
    %cst_14 = arith.constant 7.812500e-03 : f32
    %26 = vector.broadcast %cst_14 : f32 to vector<128x1xf32>
    %27 = arith.mulf %22, %26 : vector<128x1xf32>
    %cst_15 = arith.constant 7.812500e-03 : f32
    %28 = vector.broadcast %cst_15 : f32 to vector<128x1xf32>
    %29 = arith.mulf %25, %28 : vector<128x1xf32>
    %30 = arith.mulf %27, %27 : vector<128x1xf32>
    %31 = arith.subf %29, %30 : vector<128x1xf32>
    %32 = vector.broadcast %27 : vector<128x1xf32> to vector<128x128xf32>
    %33 = arith.subf %20, %32 : vector<128x128xf32>
    %cst_16 = arith.constant 9.99999974E-6 : f32
    %34 = vector.broadcast %cst_16 : f32 to vector<128x1xf32>
    %35 = arith.addf %31, %34 : vector<128x1xf32>
    %36 = math.rsqrt %35 : vector<128x1xf32>
    %37 = vector.broadcast %36 : vector<128x1xf32> to vector<128x128xf32>
    %38 = arith.mulf %33, %37 : vector<128x128xf32>
    %c0_17 = arith.constant 0 : index
    %c0_18 = arith.constant 0 : index
    %39 = vector.load %arg8[%c0_17, %c0_18] : memref<1x128xf32, #tpu.memory_space<vmem>>, vector<1x128xf32>
    %40 = vector.shape_cast %39 : vector<1x128xf32> to vector<128xf32>
    %41 = vector.shape_cast %40 : vector<128xf32> to vector<1x128xf32>
    %42 = vector.broadcast %41 : vector<1x128xf32> to vector<128x128xf32>
    %43 = arith.mulf %38, %42 : vector<128x128xf32>
    %c0_19 = arith.constant 0 : index
    %c0_20 = arith.constant 0 : index
    %44 = vector.load %arg9[%c0_19, %c0_20] : memref<1x128xf32, #tpu.memory_space<vmem>>, vector<1x128xf32>
    %45 = vector.shape_cast %44 : vector<1x128xf32> to vector<128xf32>
    %46 = vector.shape_cast %45 : vector<128xf32> to vector<1x128xf32>
    %47 = vector.broadcast %46 : vector<1x128xf32> to vector<128x128xf32>
    %48 = arith.addf %43, %47 : vector<128x128xf32>
    %c0_21 = arith.constant 0 : index
    %c0_22 = arith.constant 0 : index
    %c0_23 = arith.constant 0 : index
    %49 = vector.load %arg10[%c0_21, %c0_22, %c0_23] : memref<1x128x128xf32, #tpu.memory_space<vmem>>, vector<1x128x128xf32>
    %50 = vector.shape_cast %49 : vector<1x128x128xf32> to vector<128x128xf32>
    %51 = vector.shape_cast %48 : vector<128x128xf32> to vector<1x128x128xf32>
    tpu.vector_store %arg10[%c0_21, %c0_22, %c0_23], %51 {strides = array<i32>} : memref<1x128x128xf32, #tpu.memory_space<vmem>>, vector<1x128x128xf32>,
    return
  }
  func.func @transform_0(%arg0: i32, %arg1: i32) -> (i32, i32, i32) {
    %c0_i32 = arith.constant 0 : i32
    %c0_i32_0 = arith.constant 0 : i32
    %c0_i32_1 = arith.constant 0 : i32
    return %arg0, %c0_i32, %c0_i32_0 : i32, i32, i32
  }
  func.func @transform_1(%arg0: i32, %arg1: i32) -> (i32, i32, i32) {
    %c0_i32 = arith.constant 0 : i32
    %c0_i32_0 = arith.constant 0 : i32
    return %arg0, %arg1, %c0_i32 : i32, i32, i32
  }
  func.func @transform_2(%arg0: i32, %arg1: i32) -> (i32, i32) {
    %c0_i32 = arith.constant 0 : i32
    %c0_i32_0 = arith.constant 0 : i32
    %c0_i32_1 = arith.constant 0 : i32
    return %c0_i32, %c0_i32_0 : i32, i32
  }
  func.func @transform_3(%arg0: i32, %arg1: i32) -> (i32, i32) {
    %c0_i32 = arith.constant 0 : i32
    %c0_i32_0 = arith.constant 0 : i32
    %c0_i32_1 = arith.constant 0 : i32
    return %c0_i32, %c0_i32_0 : i32, i32
  }
  func.func @transform_4(%arg0: i32, %arg1: i32) -> (i32, i32) {
    %c0_i32 = arith.constant 0 : i32
    %c0_i32_0 = arith.constant 0 : i32
    %c0_i32_1 = arith.constant 0 : i32
    return %c0_i32, %c0_i32_0 : i32, i32
  }
  func.func @transform_5(%arg0: i32, %arg1: i32) -> (i32, i32) {
    %c0_i32 = arith.constant 0 : i32
    %c0_i32_0 = arith.constant 0 : i32
    %c0_i32_1 = arith.constant 0 : i32
    return %c0_i32, %c0_i32_0 : i32, i32
  }
  func.func @transform_6(%arg0: i32, %arg1: i32) -> (i32, i32) {
    %c0_i32 = arith.constant 0 : i32
    %c0_i32_0 = arith.constant 0 : i32
    %c0_i32_1 = arith.constant 0 : i32
    return %c0_i32, %c0_i32_0 : i32, i32
  }
  func.func @transform_7(%arg0: i32, %arg1: i32) -> (i32, i32) {
    %c0_i32 = arith.constant 0 : i32
    %c0_i32_0 = arith.constant 0 : i32
    %c0_i32_1 = arith.constant 0 : i32
    return %c0_i32, %c0_i32_0 : i32, i32
  }
  func.func @transform_8(%arg0: i32, %arg1: i32) -> (i32, i32, i32) {
    %c0_i32 = arith.constant 0 : i32
    %c0_i32_0 = arith.constant 0 : i32
    return %arg0, %arg1, %c0_i32 : i32, i32, i32
  }
}

</mosaic_0001>

<bundles_post_ra>
// kernel: tpu_custom_call.1
= control target key start
LH: loop header
LB: loop body
LE: loop exit
PB: predicated region body
PF: predicated region fallthrough
CT: control target
= control target key end

     0   :  { %s3289_s0 = inlined_call_operand.hbm [shape: f32[2,256,128], index: 0, kind: input, shape index: {}]   ;;  %s3290_s1 = inlined_call_operand.hbm [shape: bf16[2,256,256], index: 1, kind: input, shape index: {}]   ;;  %s3291_s2 = inlined_call_operand.hbm [shape: bf16[128,128], index: 2, kind: input, shape index: {}]   ;;  %s3292_s3 = inlined_call_operand.vmem [shape: f32[1,128], index: 3, kind: input, shape index: {}]   ;;  %s3293_s4 = inlined_call_operand.hbm [shape: bf16[128,128], index: 4, kind: input, shape index: {}]   ;;  %s3294_s5 = inlined_call_operand.vmem [shape: f32[1,128], index: 5, kind: input, shape index: {}]   ;;  %s3295_s6 = inlined_call_operand.vmem [shape: f32[1,128], index: 6, kind: input, shape index: {}]   ;;  %s3296_s7 = inlined_call_operand.vmem [shape: f32[1,128], index: 7, kind: input, shape index: {}]   ;;  %s3297_s8 = inlined_call_operand.hbm [shape: f32[2,256,128], index: 8, kind: output, shape index: {}]  }
   0x1   :  { %3310 = sst [smem:[#allocation25_spill]] %s3289_s0 }
   0x2   :  { %3311 = sst [smem:[#allocation26_spill]] %s3291_s2 }
   0x3   :  { %3312 = sst [smem:[#allocation27_spill]] %s3292_s3 }
   0x4   :  { %3313 = sst [smem:[#allocation28_spill]] %s3293_s4 }
   0x5   :  { %3314 = sst [smem:[#allocation29_spill]] %s3294_s5 }
   0x6   :  { %3315 = sst [smem:[#allocation30_spill]] %s3295_s6 }
   0x7   :  { %3316 = sst [smem:[#allocation31_spill]] %s3296_s7 }
   0x8   :  { %3317 = sst [smem:[#allocation32_spill]] %s3297_s8 }
   0x9   :  { %13 = vsyncpa [#allocation4], 0 }
   0xa   :  { %15 = vsyncpa [#allocation4 + $0x1], 0 }
   0xb   :  { %16 = vsyncpa [#allocation7], 0 }
   0xc   :  { %18 = vsyncpa [#allocation7 + $0x1], 0 }
   0xd   :  { %19 = vsyncpa [#allocation10], 0 }
   0xe   :  { %20 = vsyncpa [#allocation5], 0 }
   0xf   :  { %22 = vsyncpa [#allocation5 + $0x1], 0  ;;  %s2628_s27 = smov 0   ;;  %s2630_s28 = smov 0  }
  0x10   :  { %s2632_s29 = smov 0   ;;  %s2634_s30 = smov 0  }
  0x11   :  { %s2636_s9 = smov 0   ;;  %s2638_s10 = smov 0  }
  0x12   :  { %s2640_s11 = smov 0   ;;  %s2642_s12 = smov 0  }
  0x13   :  { %s2644_s13 = smov 0   ;;  %s2646_s14 = smov 0  }
  0x14   :  { %s2648_s15 = smov 0  }
  0x15 LB: > { %3318 = sst [smem:[#allocation17_spill]] %s2533_s27  ;;  %s2684_s16 = sadd.s32 4294967295, %s2573_s15   ;;  %s2573_s15 = sphi %s2648_s15, %s28_s15   ;;  %s2569_s14 = sphi %s2646_s14, %s3360_s14   ;;  %s2565_s13 = sphi %s2644_s13, %s3352_s13   ;;  %s2561_s12 = sphi %s2642_s12, %s3359_s12   ;;  %s2557_s11 = sphi %s2640_s11, %s3351_s11   ;;  %s2553_s10 = sphi %s2638_s10, %s3358_s10   ;;  %s2549_s9 = sphi %s2636_s9, %s3357_s9   ;;  %s2545_s30 = sphi %s2634_s30, %s3356_s30   ;;  %s2541_s29 = sphi %s2632_s29, %s3355_s29   ;;  %s2537_s28 = sphi %s2630_s28, %s3354_s28   ;;  %s2533_s27 = sphi %s2628_s27, %s3353_s27  }
  0x16   : > { %3319 = sst [smem:[#allocation18_spill]] %s2557_s11  ;;  %s1737_s17 = sadd.s32 4294967294, %s2573_s15  }
  0x17   : > { %3320 = sst [smem:[#allocation19_spill]] %s2561_s12  ;;  %p61_p0 = scmp.eq.s32.totalorder %s2684_s16, 0 }
  0x18   : > { %3321 = sst [smem:[#allocation20_spill]] %s2565_s13  ;;  %p88_p1 = scmp.ne.s32.totalorder %s2537_s28, %s2533_s27 }
  0x19   : > { %p240_p2 = scmp.eq.s32.totalorder %s2684_s16, 3  ;;  %p246_p3 = scmp.eq.s32.totalorder %s1737_s17, 3 }
  0x1a   : > { %p2693_p4 = por %p88_p1, %p61_p0  ;;  %p1738_p5 = scmp.ge.s32.totalorder %s2573_s15, 1 }
  0x1b   : > { %p2698_p6 = por %p246_p3, %p88_p1  ;;  %p253_p7 = scmp.lt.s32.totalorder %s2573_s15, 5 }
  0x1c   : > { %s3322_s18 = scalar_select %p2693_p4, 1, 0 }
  0x1d   : > { %s3324_s19 = scalar_select %p2698_p6, 1, 0 }
  0x1e   : > { %3323 = sst [smem:[#allocation21_spill]] %s3322_s18  ;;  %p2706_p8 = pnand %p1738_p5, %p253_p7 }
  0x1f   : > { %3325 = sst [smem:[#allocation22_spill]] %s3324_s19  ;;  %s2575_s24 = smov [#allocation8]  }
  0x20   : > { %s3326_s2 = sld [smem:[#allocation26_spill]]  ;;  %p2163_p9 = pneg %p2706_p8 }
  0x21   : > { %s266_s25 = sshll.u32 %s2575_s24, 4  ;;  %s3328_s4 = sld [smem:[#allocation28_spill]]  ;;  %s267_s25 = int_to_ptr.vmem [resolvable:$true] %s266_s25 }
  0x22   : > { %p2164_p10 = pnand %p2163_p9, %p61_p0  ;;  %s2576_s21 = smov 64  }
  0x23   : > { %s2578_s19 = smov [#allocation9]   ;;  %p54_p11 = scmp.ne.s32.totalorder %s2553_s10, %s2549_s9 }
  0x24   : > { %s283_s24 = sshll.u32 %s2578_s19, 4  ;;  %p55_p12 = scmp.eq.s32.totalorder %s2573_s15, 0  ;;  %s284_s24 = int_to_ptr.vmem [resolvable:$true] %s283_s24 }
  0x25   : > { %p60_p13 = scmp.ne.s32.totalorder %s2549_s9, %s2545_s30  ;;  %p2183_p1 = scmp.lt.s32.totalorder %s2573_s15, 4 }
  0x26   : > { %s264_s22 = sshll.u32 %s3326_s2, 4  ;;  %s2577_s2 = smov 4   ;;  %s265_s22 = int_to_ptr.hbm [resolvable:$true] %s264_s22 }
  0x27   : > { %s281_s20 = sshll.u32 %s3328_s4, 4  ;;  %p56_p3 = por %p55_p12, %p54_p11  ;;  %s282_s20 = int_to_ptr.hbm [resolvable:$true] %s281_s20 }
  0x28   : > { %2166 = dma.hbm_to_vmem [thread:$0]  (!%p2164_p10), %s265_s22, 1024, %s267_s25, [#allocation7], %s2576_s21, %s2576_s21, %s2577_s2  }
  0x29   : > { %2169 = dma.hbm_to_vmem [thread:$0]  (!%p2164_p10), %s282_s20, 1024, %s284_s24, [#allocation10], %s2576_s21, %s2576_s21, %s2577_s2  }
  0x2a   : > { %s306_s26 = sand.u32 1, %s2553_s10   ;;  %p2730_p5 = por %p61_p0, %p60_p13 }
  0x2b   : > { %s1742_s19 = sshll.u32 %s306_s26, 8  ;;  %s1956_s2 = sshll.u32 %s2569_s14, 8 }
  0x2c   : > { %s3330_s0 = sld [smem:[#allocation25_spill]]  ;;  %s310_s21 = scalar_lea.vmem [#allocation3], %s1742_s19 }
  0x2d   : > { %s318_s24 = sshll.u32 %s310_s21, 4  ;;  %p2171_p7 = pnand %p2183_p1, %p56_p3  ;;  %s319_s24 = int_to_ptr.vmem [resolvable:$true] %s318_s24 }
  0x2e   : > { %s307_s8 = scalar_lea.sflag [#allocation4], %s306_s26  ;;  %s3301_s27 = smov 128  }
  0x2f   : > { %s3302_s4 = smov 8   ;;  %s37_s19 = sadd.s32 1, %s2565_s13 }
  0x30   : > { %p38_p9 = scmp.ge.s32.totalorder %s37_s19, 2  ;;  %p82_p10 = scmp.ne.s32.totalorder %s2541_s29, %s2537_s28 }
  0x31   : > { %s328_s22 = sand.u32 1, %s2573_s15   ;;  %s330_s25 = sand.u32 1, %s2541_s29  }
  0x32   : > { %s315_s30 = scalar_lea.hbm %s3330_s0, %s1956_s2  ;;  %s75_s2 = sadd.s32 1, %s2541_s29 }
  0x33   : > { %s316_s20 = sshll.u32 %s315_s30, 4  ;;  %s3362_s19 = smov (%p38_p9, %s37_s19), 0  ;;  %s317_s20 = int_to_ptr.hbm [resolvable:$true] %s316_s20 }
  0x34   : > { %2173 = dma.hbm_to_vmem [thread:$0]  (!%p2171_p7), %s317_s20, 4096, %s319_s24, %s307_s8, %s3301_s27, %s3301_s27, %s3302_s4  }
  0x35   : > { %3331 = sst [smem:[#allocation23_spill]] %s3362_s19  ;;  %s3332_s26 = sadd.s32 1, %s2569_s14 }
  0x36   : > { %s3364_s26 = smov (!%p38_p9, %s3332_s26), %s2569_s14  ;;  %s71_s30 = ssub.s32 %s2565_s13, %s3362_s19 }
  0x37   : > { %p2758_p11 = por %p82_p10, %p55_p12  ;;  %p42_p13 = scmp.ge.s32.totalorder %s3364_s26, 2 }
  0x38   : > { %p2764_p3 = por %p240_p2, %p82_p10  ;;  %s1745_s21 = sshll.u32 %s330_s25, 7 }
  0x39   : > { %s3366_s26 = smov (%p42_p13, %s3364_s26), 0  ;;  %s1957_s24 = sshll.u32 %s2565_s13, 5 }
  0x3a   : > { %s3334_s20 = scalar_select %p2764_p3, 1, 0 }
  0x3b   : > { %s44_s27 = ssub.s32 %s2569_s14, %s3366_s26  ;;  %s1748_s4 = sshll.u32 %s2569_s14, 6 }
  0x3c   : > { %3335 = sst [smem:[#allocation24_spill]] %s3334_s20  ;;  %p45_p7 = scmp.eq.s32.totalorder %s44_s27, 0 }
  0x3d   : > { %s72_s0 = sor.u32 %s71_s30, %s44_s27  ;;  %s338_s19 = sadd.s32 %s1957_s24, %s1748_s4 }
  0x3e   : > { %p73_p12 = scmp.eq.s32.totalorder %s72_s0, 0  ;;  %s3336_s12 = sadd.s32 1, %s2553_s10 }
  0x3f   : > { %s2777_s7 = scalar_select %p45_p7, %s2553_s10, %s3336_s12  }
  0x40   : > { %s2780_s6 = scalar_select %p73_p12, %s2541_s29, %s75_s2  }
  0x41   : > { %s1749_s5 = sshll.u32 %s338_s19, 2  ;;  %s332_s20 = scalar_lea.vmem [#allocation6], %s1745_s21 }
  0x42   : > { %s343_s25 = sshll.u32 %s332_s20, 4  ;;  %s340_s18 = scalar_lea.hbm %s3290_s1, %s1749_s5  ;;  %s344_s25 = int_to_ptr.vmem [resolvable:$true] %s343_s25 }
  0x43   : > { %s341_s13 = sshll.u32 %s340_s18, 4  ;;  %p2174_p2 = pnand %p2183_p1, %p2758_p11  ;;  %s342_s13 = int_to_ptr.hbm [resolvable:$true] %s341_s13 }
  0x44   : > { %s329_s0 = scalar_lea.sflag [#allocation7], %s328_s22  ;;  %s3337_s4 = smov 8  }
  0x45   : > { %s3338_s27 = smov 128   ;;  %355 = sbr.rel (%p2706_p8) target bundleno = 884 (0x374), region = 52 }
  0x46   : > { %2176 = dma.hbm_to_vmem [thread:$0]  (!%p2174_p2), %s342_s13, 2048, %s344_s25, %s329_s0, %s3338_s27, %s3338_s27, %s3337_s4  }
  0x47   : > { %s357_s12 = sand.u32 (!%p2706_p8), 1, %s2549_s9  }
  0x48   : > { %s1751_s19 = sshll.u32 (!%p2706_p8), %s357_s12, 8  ;;  %s358_s3 = scalar_lea.sflag (!%p2706_p8), [#allocation4], %s357_s12 }
  0x49   : > { %s2795_s5 = scalar_lea.vmem (!%p2706_p8), [#allocation3], %s1751_s19 }
  0x4a   : > { %2512 = dma.done.wait (%p2730_p5), %s358_s3, 4096  }
  0x4b   : > { %2514 = vsyncadd (%p2730_p5), %s358_s3, 4294963200  ;;  %s367_s13 = sand.u32 1, %s2684_s16   ;;  %s369_s18 = sand.u32 1, %s2537_s28  }
  0x4c   : > { %s1752_s23 = sshll.u32 %s369_s18, 7  ;;  %s368_s2 = scalar_lea.sflag [#allocation7], %s367_s13 }
  0x4d   : > { %s2805_s22 = scalar_lea.vmem [#allocation6], %s1752_s23 }
  0x4e   : > { %2516 = dma.done.wait (%p2693_p4), %s368_s2, 2048  }
  0x4f   : > { %2518 = vsyncadd (%p2693_p4), %s368_s2, 4294965248 }
  0x50   : > { %2520 = dma.done.wait (%p61_p0), [#allocation7], 1024  }
  0x51   : > { %2522 = vsyncadd (%p61_p0), [#allocation7], 4294966272 }
  0x52   : > { %2524 = dma.done.wait (%p61_p0), [#allocation10], 1024  }
  0x53   : > { %2526 = vsyncadd (%p61_p0), [#allocation10], 4294966272  ;;  %s2819_s17 = scalar_lea.vmem [#allocation11], %s1752_s23  ;;  %s3340_s30 = sld [smem:[#allocation18_spill]] }
  0x59   : > { %p1756_p8 = scmp.ne.s32.totalorder %s3340_s30, 0 }
  0x5a   : > { %s3341_s20 = sld [smem:[#allocation27_spill]] (!%p1756_p8) }
  0x5b   : > { %425 = sbr.rel (%p1756_p8) target bundleno = 323 (0x143), region = 72 }
  0x60   : > { %v1965_v0 = vld [vmem:[#allocation8 + $0x38] sm:$0xff]  ;;  %v1964_v1 = vld [vmem:[#allocation8 + $0x30] sm:$0xff]  ;;  %v1963_v2 = vld [vmem:[#allocation8 + $0x28] sm:$0xff] }
  0x61   : > { %542 = vmatpush.bf16.msra.mxu0 %v1965_v0  ;;  %2101 = vmatpush.bf16.msra.mxu1 %v1965_v0  ;;  %v1962_v3 = vld [vmem:[#allocation8 + $0x20] sm:$0xff]  ;;  %v1961_v4 = vld [vmem:[#allocation8 + $0x18] sm:$0xff]  ;;  %v1960_v5 = vld [vmem:[#allocation8 + $0x10] sm:$0xff] }
  0x62   : > { %2102 = vmatpush.bf16.msra.mxu2 %v1965_v0  ;;  %2103 = vmatpush.bf16.msra.mxu3 %v1965_v0  ;;  %v1959_v6 = vld [vmem:[#allocation8 + $0x8] sm:$0xff]  ;;  %v1958_v7 = vld [vmem:[#allocation8] sm:$0xff]  ;;  %v428_v20 = vld [vmem:[%s2795_s5 + $0x10] sm:$0xff] }
  0x63   : > { %v426_v8 = vld [vmem:[%s2795_s5] sm:$0xff]  ;;  %v427_v9 = vld [vmem:[%s2795_s5 + $0x8] sm:$0xff]  ;;  %v429_v21 = vld [vmem:[%s2795_s5 + $0x18] sm:$0xff] }
  0x64   : > { %v434_v10 = vld [vmem:[%s2795_s5 + $0x40] sm:$0xff]  ;;  %v435_v11 = vld [vmem:[%s2795_s5 + $0x48] sm:$0xff]  ;;  %v458_v16 = vpack.c.bf16 %v427_v9, %v426_v8  ;;  %v436_v22 = vld [vmem:[%s2795_s5 + $0x50] sm:$0xff]  ;;  %v459_v28 = vpack.c.bf16 %v429_v21, %v428_v20 }
  0x65   : > { %543 = vmatpush.bf16.msra.mxu0 %v1964_v1  ;;  %2104 = vmatpush.bf16.msra.mxu1 %v1964_v1  ;;  %v442_v12 = vld [vmem:[%s2795_s5 + $0x80] sm:$0xff]  ;;  %v443_v13 = vld [vmem:[%s2795_s5 + $0x88] sm:$0xff]  ;;  %v462_v17 = vpack.c.bf16 %v435_v11, %v434_v10  ;;  %v437_v23 = vld [vmem:[%s2795_s5 + $0x58] sm:$0xff] }
  0x66   : > { %2105 = vmatpush.bf16.msra.mxu2 %v1964_v1  ;;  %2106 = vmatpush.bf16.msra.mxu3 %v1964_v1  ;;  %v450_v14 = vld [vmem:[%s2795_s5 + $0xc0] sm:$0xff]  ;;  %v451_v15 = vld [vmem:[%s2795_s5 + $0xc8] sm:$0xff]  ;;  %v466_v18 = vpack.c.bf16 %v443_v13, %v442_v12  ;;  %v444_v24 = vld [vmem:[%s2795_s5 + $0x90] sm:$0xff]  ;;  %v463_v29 = vpack.c.bf16 %v437_v23, %v436_v22 }
  0x67   : > { %v470_v19 = vpack.c.bf16 %v451_v15, %v450_v14  ;;  %v445_v25 = vld [vmem:[%s2795_s5 + $0x98] sm:$0xff]  ;;  %v452_v26 = vld [vmem:[%s2795_s5 + $0xd0] sm:$0xff]  ;;  %v430_v32 = vld [vmem:[%s2795_s5 + $0x20] sm:$0xff] }
  0x68   : > { %v453_v27 = vld [vmem:[%s2795_s5 + $0xd8] sm:$0xff]  ;;  %v467_v30 = vpack.c.bf16 %v445_v25, %v444_v24  ;;  %v431_v33 = vld [vmem:[%s2795_s5 + $0x28] sm:$0xff]  ;;  %v438_v34 = vld [vmem:[%s2795_s5 + $0x60] sm:$0xff] }
  0x69   : > { %544 = vmatpush.bf16.msra.mxu0 %v1963_v2  ;;  %2107 = vmatpush.bf16.msra.mxu1 %v1963_v2  ;;  %v471_v31 = vpack.c.bf16 %v453_v27, %v452_v26  ;;  %v439_v35 = vld [vmem:[%s2795_s5 + $0x68] sm:$0xff]  ;;  %v446_v36 = vld [vmem:[%s2795_s5 + $0xa0] sm:$0xff]  ;;  %v460_v40 = vpack.c.bf16 %v431_v33, %v430_v32  ;;  %v432_v44 = vld [vmem:[%s2795_s5 + $0x30] sm:$0xff] }
  0x6a   : > { %2108 = vmatpush.bf16.msra.mxu2 %v1963_v2  ;;  %2109 = vmatpush.bf16.msra.mxu3 %v1963_v2  ;;  %v447_v37 = vld [vmem:[%s2795_s5 + $0xa8] sm:$0xff]  ;;  %v454_v38 = vld [vmem:[%s2795_s5 + $0xe0] sm:$0xff]  ;;  %v464_v41 = vpack.c.bf16 %v439_v35, %v438_v34  ;;  %v433_v45 = vld [vmem:[%s2795_s5 + $0x38] sm:$0xff] }
  0x6b   : > { %v455_v39 = vld [vmem:[%s2795_s5 + $0xe8] sm:$0xff]  ;;  %v468_v42 = vpack.c.bf16 %v447_v37, %v446_v36  ;;  %v440_v46 = vld [vmem:[%s2795_s5 + $0x70] sm:$0xff]  ;;  %v441_v47 = vld [vmem:[%s2795_s5 + $0x78] sm:$0xff]  ;;  %v461_v52 = vpack.c.bf16 %v433_v45, %v432_v44 }
  0x6c   : > { %v472_v43 = vpack.c.bf16 %v455_v39, %v454_v38  ;;  %v448_v48 = vld [vmem:[%s2795_s5 + $0xb0] sm:$0xff]  ;;  %v449_v49 = vld [vmem:[%s2795_s5 + $0xb8] sm:$0xff]  ;;  %v465_v53 = vpack.c.bf16 %v441_v47, %v440_v46  ;;  %v2857_v58 = vld [vmem:[%s3341_s20] ss:$0 sm:$0xff] }
  0x6d   : > { %545 = vmatpush.bf16.msra.mxu0 %v1962_v3  ;;  %2110 = vmatpush.bf16.msra.mxu1 %v1962_v3  ;;  %v456_v50 = vld [vmem:[%s2795_s5 + $0xf0] sm:$0xff]  ;;  %v457_v51 = vld [vmem:[%s2795_s5 + $0xf8] sm:$0xff]  ;;  %v469_v54 = vpack.c.bf16 %v449_v49, %v448_v48 }
  0x6e   : > { %2111 = vmatpush.bf16.msra.mxu2 %v1962_v3  ;;  %2112 = vmatpush.bf16.msra.mxu3 %v1962_v3  ;;  %v473_v55 = vpack.c.bf16 %v457_v51, %v456_v50 }
  0x71   : > { %546 = vmatpush.bf16.msra.mxu0 %v1961_v4  ;;  %2113 = vmatpush.bf16.msra.mxu1 %v1961_v4 }
  0x72   : > { %2114 = vmatpush.bf16.msra.mxu2 %v1961_v4  ;;  %2115 = vmatpush.bf16.msra.mxu3 %v1961_v4 }
  0x75   : > { %547 = vmatpush.bf16.msra.mxu0 %v1960_v5  ;;  %2116 = vmatpush.bf16.msra.mxu1 %v1960_v5 }
  0x76   : > { %2117 = vmatpush.bf16.msra.mxu2 %v1960_v5  ;;  %2118 = vmatpush.bf16.msra.mxu3 %v1960_v5 }
  0x79   : > { %548 = vmatpush.bf16.msra.mxu0 %v1959_v6  ;;  %2119 = vmatpush.bf16.msra.mxu1 %v1959_v6 }
  0x7a   : > { %2120 = vmatpush.bf16.msra.mxu2 %v1959_v6  ;;  %2121 = vmatpush.bf16.msra.mxu3 %v1959_v6 }
  0x7d   : > { %549 = vmatpush.bf16.msra.mxu0 %v1958_v7  ;;  %2122 = vmatpush.bf16.msra.mxu1 %v1958_v7 }
  0x7e   : > { %2123 = vmatpush.bf16.msra.mxu2 %v1958_v7  ;;  %2124 = vmatpush.bf16.msra.mxu3 %v1958_v7 }
  0x80   : > { %550 = vmatmul.bf16.vlgmr.msra.gmra.mxu0 %v458_v16  ;;  %570 = vmatmul.bf16.vlgmr.msra.gmra.mxu1 %v462_v17 }
  0x81   : > { %590 = vmatmul.bf16.vlgmr.msra.gmra.mxu2 %v466_v18  ;;  %610 = vmatmul.bf16.vlgmr.msra.gmra.mxu3 %v470_v19 }
  0x90   : > { %555 = vmatmul.bf16.gmra.mxu0 %v459_v28  ;;  %575 = vmatmul.bf16.gmra.mxu1 %v463_v29 }
  0x91   : > { %595 = vmatmul.bf16.gmra.mxu2 %v467_v30  ;;  %615 = vmatmul.bf16.gmra.mxu3 %v471_v31 }
  0xa0   : > { %560 = vmatmul.bf16.gmra.mxu0 %v460_v40  ;;  %580 = vmatmul.bf16.gmra.mxu1 %v464_v41 }
  0xa1   : > { %600 = vmatmul.bf16.gmra.mxu2 %v468_v42  ;;  %620 = vmatmul.bf16.gmra.mxu3 %v472_v43 }
  0xb0   : > { %565 = vmatmul.bf16.gmra.mxu0 %v461_v52  ;;  %585 = vmatmul.bf16.gmra.mxu1 %v465_v53 }
  0xb1   : > { %605 = vmatmul.bf16.gmra.mxu2 %v469_v54  ;;  %625 = vmatmul.bf16.gmra.mxu3 %v473_v55 }
  0xfd   : > { %v551_v56 = vpop.f32.mrf.mxu0  ;;  %v571_v57 = vpop.f32.mrf.mxu1 }
  0xfe   : > { %v552_v63 = vadd.f32 %v2857_v58, %v551_v56  ;;  %v572_v0 = vadd.f32 %v2857_v58, %v571_v57 }
 0x104   : > { %v591_v59 = vpop.f32.mrf.mxu2  ;;  %v611_v60 = vpop.f32.mrf.mxu3 }
 0x105   : > { %v553_v61 = vpop.f32.mrf.mxu0  ;;  %v573_v62 = vpop.f32.mrf.mxu1  ;;  %v592_v7 = vadd.f32 %v2857_v58, %v591_v59  ;;  %v612_v8 = vadd.f32 %v2857_v58, %v611_v60 }
 0x106   : > { %v554_v1 = vadd.f32 %v2857_v58, %v553_v61  ;;  %v574_v2 = vadd.f32 %v2857_v58, %v573_v62 }
 0x108   : > { %v2009_v3 = vpack.c.bf16 %v554_v1, %v552_v63  ;;  %v2029_v4 = vpack.c.bf16 %v574_v2, %v572_v0 }
 0x10a   : > { %2010 = vst [vmem:[#allocation2 + $0x30] sm:$0xff] %v2009_v3  }
 0x10b   : > { %2089 = vst [vmem:[#allocation2 + $0x50] sm:$0xff] %v2029_v4  }
 0x10c   : > { %v593_v5 = vpop.f32.mrf.mxu2  ;;  %v613_v6 = vpop.f32.mrf.mxu3 }
 0x10d   : > { %v594_v9 = vadd.f32 %v2857_v58, %v593_v5  ;;  %v614_v10 = vadd.f32 %v2857_v58, %v613_v6  ;;  %v556_v11 = vpop.f32.mrf.mxu0  ;;  %v576_v12 = vpop.f32.mrf.mxu1 }
 0x10e   : > { %v557_v19 = vadd.f32 %v2857_v58, %v556_v11  ;;  %v577_v20 = vadd.f32 %v2857_v58, %v576_v12 }
 0x10f   : > { %v2049_v13 = vpack.c.bf16 %v594_v9, %v592_v7  ;;  %v2069_v14 = vpack.c.bf16 %v614_v10, %v612_v8 }
 0x111   : > { %2093 = vst [vmem:[#allocation2 + $0x40] sm:$0xff] %v2049_v13  }
 0x112   : > { %2097 = vst [vmem:[#allocation2 + $0x60] sm:$0xff] %v2069_v14  }
 0x114   : > { %v596_v15 = vpop.f32.mrf.mxu2  ;;  %v616_v16 = vpop.f32.mrf.mxu3 }
 0x115   : > { %v558_v17 = vpop.f32.mrf.mxu0  ;;  %v578_v18 = vpop.f32.mrf.mxu1  ;;  %v597_v27 = vadd.f32 %v2857_v58, %v596_v15  ;;  %v617_v28 = vadd.f32 %v2857_v58, %v616_v16 }
 0x116   : > { %v559_v21 = vadd.f32 %v2857_v58, %v558_v17  ;;  %v579_v22 = vadd.f32 %v2857_v58, %v578_v18 }
 0x118   : > { %v2014_v23 = vpack.c.bf16 %v559_v21, %v557_v19  ;;  %v2034_v24 = vpack.c.bf16 %v579_v22, %v577_v20 }
 0x11a   : > { %2086 = vst [vmem:[#allocation2] sm:$0xff] %v2014_v23  }
 0x11b   : > { %2090 = vst [vmem:[#allocation2 + $0x68] sm:$0xff] %v2034_v24  }
 0x11c   : > { %v598_v25 = vpop.f32.mrf.mxu2  ;;  %v618_v26 = vpop.f32.mrf.mxu3 }
 0x11d   : > { %v599_v29 = vadd.f32 %v2857_v58, %v598_v25  ;;  %v619_v30 = vadd.f32 %v2857_v58, %v618_v26  ;;  %v561_v31 = vpop.f32.mrf.mxu0  ;;  %v581_v32 = vpop.f32.mrf.mxu1 }
 0x11e   : > { %v562_v39 = vadd.f32 %v2857_v58, %v561_v31  ;;  %v582_v40 = vadd.f32 %v2857_v58, %v581_v32 }
 0x11f   : > { %v2054_v33 = vpack.c.bf16 %v599_v29, %v597_v27  ;;  %v2074_v34 = vpack.c.bf16 %v619_v30, %v617_v28 }
 0x121   : > { %2094 = vst [vmem:[#allocation2 + $0x20] sm:$0xff] %v2054_v33  }
 0x122   : > { %2098 = vst [vmem:[#allocation2 + $0x70] sm:$0xff] %v2074_v34  }
 0x124   : > { %v601_v35 = vpop.f32.mrf.mxu2  ;;  %v621_v36 = vpop.f32.mrf.mxu3 }
 0x125   : > { %v563_v37 = vpop.f32.mrf.mxu0  ;;  %v583_v38 = vpop.f32.mrf.mxu1  ;;  %v602_v47 = vadd.f32 %v2857_v58, %v601_v35  ;;  %v622_v48 = vadd.f32 %v2857_v58, %v621_v36 }
 0x126   : > { %v564_v41 = vadd.f32 %v2857_v58, %v563_v37  ;;  %v584_v42 = vadd.f32 %v2857_v58, %v583_v38 }
 0x128   : > { %v2019_v43 = vpack.c.bf16 %v564_v41, %v562_v39  ;;  %v2039_v44 = vpack.c.bf16 %v584_v42, %v582_v40 }
 0x12a   : > { %2087 = vst [vmem:[#allocation2 + $0x58] sm:$0xff] %v2019_v43  }
 0x12b   : > { %2091 = vst [vmem:[#allocation2 + $0x8] sm:$0xff] %v2039_v44  }
 0x12c   : > { %v603_v45 = vpop.f32.mrf.mxu2  ;;  %v623_v46 = vpop.f32.mrf.mxu3 }
 0x12d   : > { %v604_v49 = vadd.f32 %v2857_v58, %v603_v45  ;;  %v624_v50 = vadd.f32 %v2857_v58, %v623_v46  ;;  %v566_v51 = vpop.f32.mrf.mxu0  ;;  %v586_v52 = vpop.f32.mrf.mxu1 }
 0x12e   : > { %v567_v60 = vadd.f32 %v2857_v58, %v566_v51  ;;  %v587_v61 = vadd.f32 %v2857_v58, %v586_v52 }
 0x12f   : > { %v2059_v53 = vpack.c.bf16 %v604_v49, %v602_v47  ;;  %v2079_v54 = vpack.c.bf16 %v624_v50, %v622_v48 }
 0x131   : > { %2095 = vst [vmem:[#allocation2 + $0x10] sm:$0xff] %v2059_v53  }
 0x132   : > { %2099 = vst [vmem:[#allocation2 + $0x78] sm:$0xff] %v2079_v54  }
 0x134   : > { %v606_v55 = vpop.f32.mrf.mxu2  ;;  %v626_v56 = vpop.f32.mrf.mxu3 }
 0x135   : > { %v568_v57 = vpop.f32.mrf.mxu0  ;;  %v588_v59 = vpop.f32.mrf.mxu1  ;;  %v607_v4 = vadd.f32 %v2857_v58, %v606_v55  ;;  %v627_v5 = vadd.f32 %v2857_v58, %v626_v56 }
 0x136   : > { %v569_v62 = vadd.f32 %v2857_v58, %v568_v57  ;;  %v589_v63 = vadd.f32 %v2857_v58, %v588_v59 }
 0x138   : > { %v2024_v0 = vpack.c.bf16 %v569_v62, %v567_v60  ;;  %v2044_v1 = vpack.c.bf16 %v589_v63, %v587_v61 }
 0x13a   : > { %2088 = vst [vmem:[#allocation2 + $0x18] sm:$0xff] %v2024_v0  }
 0x13b   : > { %2092 = vst [vmem:[#allocation2 + $0x48] sm:$0xff] %v2044_v1  }
 0x13c   : > { %v608_v2 = vpop.f32.mrf.mxu2  ;;  %v628_v3 = vpop.f32.mrf.mxu3 }
 0x13d   : > { %v609_v6 = vadd.f32 %v2857_v58, %v608_v2  ;;  %v629_v7 = vadd.f32 %v2857_v58, %v628_v3 }
 0x13f   : > { %v2064_v8 = vpack.c.bf16 %v609_v6, %v607_v4  ;;  %v2084_v9 = vpack.c.bf16 %v629_v7, %v627_v5 }
 0x141   : > { %2096 = vst [vmem:[#allocation2 + $0x38] sm:$0xff] %v2064_v8  }
 0x142   : > { %2100 = vst [vmem:[#allocation2 + $0x28] sm:$0xff] %v2084_v9  }
 0x143 PF: > { %v1989_v10 = vld [vmem:[#allocation2 + $0x48] sm:$0xff]  ;;  %v1996_v13 = vld [vmem:[#allocation2 + $0x78] sm:$0xff]  ;;  %v1995_v15 = vld [vmem:[#allocation2 + $0x70] sm:$0xff]  ;;  %s3342_s21 = sld [smem:[#allocation18_spill]]  ;;  %s1599_s0 = sshll.u32 %s2819_s17, 4  ;;  %s1600_s0 = int_to_ptr.vmem [resolvable:$true] %s1599_s0 }
 0x144   : > { %919 = vmatpush.bf16.msra.mxu0 %v1989_v10  ;;  %2125 = vmatpush.bf16.msra.mxu3 %v1989_v10  ;;  %v1988_v12 = vld [vmem:[#allocation2 + $0x8] sm:$0xff]  ;;  %v1986_v58 = vld [vmem:[#allocation2 + $0x50] sm:$0xff]  ;;  %v1994_v16 = vld [vmem:[#allocation2 + $0x60] sm:$0xff]  ;;  %s3343_s4 = sld [smem:[#allocation29_spill]] }
 0x145   : > { %v1987_v14 = vld [vmem:[#allocation2 + $0x68] sm:$0xff]  ;;  %v1985_v17 = vld [vmem:[#allocation2 + $0x18] sm:$0xff]  ;;  %v1992_v20 = vld [vmem:[#allocation2 + $0x10] sm:$0xff]  ;;  %s3344_s3 = sld [smem:[#allocation30_spill]] }
 0x146   : > { %v1984_v19 = vld [vmem:[#allocation2 + $0x58] sm:$0xff]  ;;  %v1983_v21 = vld [vmem:[#allocation2] sm:$0xff]  ;;  %v1982_v23 = vld [vmem:[#allocation2 + $0x30] sm:$0xff]  ;;  %s3345_s13 = sld [smem:[#allocation31_spill]] }
 0x147   : > { %v1991_v22 = vld [vmem:[#allocation2 + $0x20] sm:$0xff]  ;;  %v1967_v25 = vld [vmem:[%s2805_s22 + $0x4] sm:$0xf0]  ;;  %v1793_v30 = vld [vmem:[%s2805_s22 + $0x8] sm:$0xf0]  ;;  %s3346_s23 = sld [smem:[#allocation19_spill]] }
 0x148   : > { %920 = vmatpush.bf16.msra.mxu0 %v1988_v12  ;;  %2126 = vmatpush.bf16.msra.mxu3 %v1988_v12  ;;  %v1993_v18 = vld [vmem:[#allocation2 + $0x38] sm:$0xff]  ;;  %v1791_v24 = vld [vmem:[%s2805_s22] sm:$0xf]  ;;  %v1979_v27 = vld [vmem:[%s2805_s22 + $0x64] sm:$0xf0] }
 0x149   : > { %v1997_v11 = vld [vmem:[#allocation2 + $0x28] sm:$0xff]  ;;  %v1839_v26 = vld [vmem:[%s2805_s22 + $0x60] sm:$0xf]  ;;  %v1966_v29 = vld [vmem:[%s2805_s22 + $0x4] sm:$0xf]  ;;  %v1792_v31 = vor.u32 %v1967_v25, %v1791_v24  ;;  %s1949_s24 = sshll.u32 %s3342_s21, 7 }
 0x14a   : > { %968 = vmatpush.bf16.msra.mxu1 %v1997_v11  ;;  %v1990_v28 = vld [vmem:[#allocation2 + $0x40] sm:$0xff]  ;;  %v1840_v32 = vor.u32 %v1979_v27, %v1839_v26  ;;  %v1796_v33 = vor.u32 %v1966_v29, %v1793_v30  ;;  %v1799_v34 = vld [vmem:[%s2805_s22 + $0x10] sm:$0xf]  ;;  %v1969_v35 = vld [vmem:[%s2805_s22 + $0x14] sm:$0xf0]  ;;  %s2930_s27 = scalar_lea.vmem %s2795_s5, %s1949_s24 [#allocation3]  ;;  %s1951_s2 = sshll.u32 %s3342_s21, 4 }
 0x14b   : > { %v1847_v36 = vld [vmem:[%s2805_s22 + $0x70] sm:$0xf]  ;;  %v1981_v37 = vld [vmem:[%s2805_s22 + $0x74] sm:$0xf0]  ;;  %v1968_v38 = vld [vmem:[%s2805_s22 + $0x14] sm:$0xf]  ;;  %v1800_v40 = vor.u32 %v1969_v35, %v1799_v34 }
 0x14c   : > { %921 = vmatpush.bf16.msra.mxu0 %v1987_v14  ;;  %2127 = vmatpush.bf16.msra.mxu3 %v1987_v14  ;;  %v1801_v39 = vld [vmem:[%s2805_s22 + $0x18] sm:$0xf0]  ;;  %v1848_v41 = vor.u32 %v1981_v37, %v1847_v36  ;;  %v1807_v43 = vld [vmem:[%s2805_s22 + $0x20] sm:$0xf]  ;;  %v1971_v44 = vld [vmem:[%s2805_s22 + $0x24] sm:$0xf0] }
 0x14d   : > { %v1804_v42 = vor.u32 %v1968_v38, %v1801_v39  ;;  %v1978_v45 = vld [vmem:[%s2805_s22 + $0x64] sm:$0xf]  ;;  %v1841_v46 = vld [vmem:[%s2805_s22 + $0x68] sm:$0xf0]  ;;  %v1808_v49 = vor.u32 %v1971_v44, %v1807_v43  ;;  %v1815_v52 = vld [vmem:[%s2805_s22 + $0x30] sm:$0xf] }
 0x14e   : > { %969 = vmatpush.bf16.msra.mxu1 %v1996_v13  ;;  %v1970_v47 = vld [vmem:[%s2805_s22 + $0x24] sm:$0xf]  ;;  %v1809_v48 = vld [vmem:[%s2805_s22 + $0x28] sm:$0xf0]  ;;  %v1844_v50 = vor.u32 %v1978_v45, %v1841_v46  ;;  %v1973_v53 = vld [vmem:[%s2805_s22 + $0x34] sm:$0xf0] }
 0x14f   : > { %v1812_v51 = vor.u32 %v1970_v47, %v1809_v48  ;;  %v1980_v54 = vld [vmem:[%s2805_s22 + $0x74] sm:$0xf]  ;;  %v1849_v55 = vld [vmem:[%s2805_s22 + $0x78] sm:$0xf0]  ;;  %v1816_v59 = vor.u32 %v1973_v53, %v1815_v52  ;;  %v2003_v0 = vld [vmem:[#allocation9 + $0x28] sm:$0xff]  ;;  %s3347_s21 = sld [smem:[#allocation32_spill]] }
 0x150   : > { %922 = vmatpush.bf16.msra.mxu0 %v1986_v58  ;;  %2128 = vmatpush.bf16.msra.mxu3 %v1986_v58  ;;  %v1972_v56 = vld [vmem:[%s2805_s22 + $0x34] sm:$0xf]  ;;  %v1817_v57 = vld [vmem:[%s2805_s22 + $0x38] sm:$0xf0]  ;;  %v1852_v60 = vor.u32 %v1980_v54, %v1849_v55  ;;  %v1823_v1 = vld [vmem:[%s2805_s22 + $0x40] sm:$0xf] }
 0x151   : > { %v1820_v61 = vor.u32 %v1972_v56, %v1817_v57  ;;  %v2005_v62 = vld [vmem:[#allocation9 + $0x38] sm:$0xff]  ;;  %v2004_v63 = vld [vmem:[#allocation9 + $0x30] sm:$0xff]  ;;  %v1975_v2 = vld [vmem:[%s2805_s22 + $0x44] sm:$0xf0] }
 0x152   : > { %970 = vmatpush.bf16.msra.mxu1 %v1995_v15  ;;  %1093 = vmatpush.bf16.msra.mxu2 %v2005_v62  ;;  %v1974_v3 = vld [vmem:[%s2805_s22 + $0x44] sm:$0xf]  ;;  %v1825_v4 = vld [vmem:[%s2805_s22 + $0x48] sm:$0xf0]  ;;  %v1824_v6 = vor.u32 %v1975_v2, %v1823_v1  ;;  %v2001_v8 = vld [vmem:[#allocation9 + $0x18] sm:$0xff] }
 0x153   : > { %v2002_v5 = vld [vmem:[#allocation9 + $0x20] sm:$0xff]  ;;  %v1828_v7 = vor.u32 %v1974_v3, %v1825_v4  ;;  %v1831_v9 = vld [vmem:[%s2805_s22 + $0x50] sm:$0xf]  ;;  %v1977_v10 = vld [vmem:[%s2805_s22 + $0x54] sm:$0xf0] }
 0x154   : > { %923 = vmatpush.bf16.msra.mxu0 %v1985_v17  ;;  %2129 = vmatpush.bf16.msra.mxu3 %v1985_v17  ;;  %v1833_v12 = vld [vmem:[%s2805_s22 + $0x58] sm:$0xf0]  ;;  %v1999_v58 = vld [vmem:[#allocation9 + $0x8] sm:$0xff] }
 0x155   : > { %s2459_s11 = scalar_lea.hbm %s3347_s21, 512 }
 0x156   : > { %971 = vmatpush.bf16.msra.mxu1 %v1994_v16  ;;  %1094 = vmatpush.bf16.msra.mxu2 %v2004_v63 }
 0x158   : > { %924 = vmatpush.bf16.msra.mxu0 %v1984_v19  ;;  %2130 = vmatpush.bf16.msra.mxu3 %v1984_v19 }
 0x15a   : > { %972 = vmatpush.bf16.msra.mxu1 %v1993_v18  ;;  %1095 = vmatpush.bf16.msra.mxu2 %v2003_v0 }
 0x15c   : > { %925 = vmatpush.bf16.msra.mxu0 %v1983_v21  ;;  %2131 = vmatpush.bf16.msra.mxu3 %v1983_v21 }
 0x15e   : > { %973 = vmatpush.bf16.msra.mxu1 %v1992_v20  ;;  %1096 = vmatpush.bf16.msra.mxu2 %v2002_v5 }
 0x160   : > { %926 = vmatpush.bf16.msra.mxu0 %v1982_v23  ;;  %2132 = vmatpush.bf16.msra.mxu3 %v1982_v23 }
 0x162   : > { %974 = vmatpush.bf16.msra.mxu1 %v1991_v22  ;;  %1097 = vmatpush.bf16.msra.mxu2 %v2001_v8 }
 0x163   : > { %927 = vmatmul.bf16.vlgmr.msra.gmra.mxu0 %v1792_v31  ;;  %957 = vmatmul.bf16.vlgmr.msra.gmra.mxu3 %v1840_v32 }
 0x164   : > { %2133 = vmatpush.bf16.msrb.mxu3 %v1997_v11  ;;  %v1976_v11 = vld [vmem:[%s2805_s22 + $0x54] sm:$0xf]  ;;  %s1952_s22 = sshll.u32 %s3346_s23, 5 }
 0x165   : > { %v1836_v14 = vor.u32 %v1976_v11, %v1833_v12  ;;  %v1144_v12 = vld [vmem:[%s2930_s27] sm:$0xff]  ;;  %s1596_s30 = sadd.s32 %s1952_s22, %s1951_s2 }
 0x166   : > { %975 = vmatpush.bf16.msra.mxu1 %v1990_v28  ;;  %s1953_s16 = sshll.u32 %s1596_s30, 3 }
 0x167   : > { %s1598_s24 = scalar_lea.hbm %s3347_s21, %s1953_s16 }
 0x168   : > { %2134 = vmatpush.bf16.msrb.mxu3 %v1996_v13  ;;  %v1832_v13 = vor.u32 %v1977_v10, %v1831_v9  ;;  %v2927_v10 = vld [vmem:[%s3343_s4] ss:$0 sm:$0xff]  ;;  %s1601_s4 = sshll.u32 %s1598_s24, 4  ;;  %s1602_s4 = int_to_ptr.hbm [resolvable:$true] %s1601_s4 }
 0x169   : > { %976 = vmatmul.bf16.vlgmr.msra.gmra.mxu1 %v1796_v33  ;;  %s2453_s12 = sshra.s32 %s1602_s4, 4  ;;  %s2454_s12 = int_to_ptr.hbm [resolvable:$true] %s2453_s12 }
 0x16a   : > { %s2455_s19 = scalar_lea.hbm %s2454_s12, 128  ;;  %p2460_p5 = scmp.lt.s32.totalorder %s2454_s12, %s3347_s21 }
 0x16b   : > { %p2456_p0 = scmp.ne.s32.totalorder %s2454_s12, %s2455_s19  ;;  %p2461_p9 = scmp.lt.s32.totalorder %s2459_s11, %s2455_s19 }
 0x16c   : > { %2135 = vmatpush.bf16.msrb.mxu3 %v1995_v15  ;;  %v2000_v15 = vld [vmem:[#allocation9 + $0x10] sm:$0xff] }
 0x16d   : > { %1098 = vmatpush.bf16.msra.mxu2 %v2000_v15  ;;  %p2457_p4 = pnand %p2456_p0, %p2764_p3  ;;  %p2462_p10 = por %p2461_p9, %p2460_p5 }
 0x16f   : > { %p2458_p1 = pneg %p2457_p4 }
 0x170   : > { %2136 = vmatpush.bf16.msrb.mxu3 %v1994_v16  ;;  %v1998_v16 = vld [vmem:[#allocation9] sm:$0xff] }
 0x171   : > { %1099 = vmatpush.bf16.msra.mxu2 %v1999_v58  ;;  %p2463_p11 = pnand %p2462_p10, %p2458_p1 }
 0x173   : > { %932 = vmatmul.bf16.gmra.mxu0 %v1800_v40  ;;  %962 = vmatmul.bf16.gmra.mxu3 %v1848_v41 }
 0x174   : > { %2137 = vmatpush.bf16.msrb.mxu3 %v1993_v18 }
 0x175   : > { %1100 = vmatpush.bf16.msra.mxu2 %v1998_v16 }
 0x178   : > { %2138 = vmatpush.bf16.msrb.mxu3 %v1992_v20 }
 0x179   : > { %981 = vmatmul.bf16.gmra.mxu1 %v1804_v42 }
 0x17c   : > { %2139 = vmatpush.bf16.msrb.mxu3 %v1991_v22 }
 0x180   : > { %2140 = vmatpush.bf16.msrb.mxu3 %v1990_v28 }
 0x183   : > { %937 = vmatmul.bf16.gmra.mxu0 %v1808_v49  ;;  %1006 = vmatmul.bf16.vlgmr.msrb.gmra.mxu3 %v1844_v50 }
 0x184   : > { %2141 = vmatpush.bf16.msra.mxu3 %v2005_v62 }
 0x188   : > { %2142 = vmatpush.bf16.msra.mxu3 %v2004_v63 }
 0x189   : > { %986 = vmatmul.bf16.gmra.mxu1 %v1812_v51 }
 0x18c   : > { %2143 = vmatpush.bf16.msra.mxu3 %v2003_v0 }
 0x190   : > { %2144 = vmatpush.bf16.msra.mxu3 %v2002_v5 }
 0x193   : > { %942 = vmatmul.bf16.gmra.mxu0 %v1816_v59  ;;  %1011 = vmatmul.bf16.gmra.mxu3 %v1852_v60 }
 0x194   : > { %2145 = vmatpush.bf16.msra.mxu3 %v2001_v8 }
 0x198   : > { %2146 = vmatpush.bf16.msra.mxu3 %v2000_v15 }
 0x199   : > { %991 = vmatmul.bf16.gmra.mxu1 %v1820_v61 }
 0x19c   : > { %2147 = vmatpush.bf16.msra.mxu3 %v1999_v58 }
 0x1a0   : > { %2148 = vmatpush.bf16.msra.mxu3 %v1998_v16  ;;  %v1145_v16 = vld [vmem:[%s2930_s27 + $0x8] sm:$0xff] }
 0x1a3   : > { %947 = vmatmul.bf16.gmra.mxu0 %v1824_v6 }
 0x1a9   : > { %996 = vmatmul.bf16.gmra.mxu1 %v1828_v7 }
 0x1b3   : > { %952 = vmatmul.bf16.gmra.mxu0 %v1832_v13 }
 0x1b9   : > { %1001 = vmatmul.bf16.gmra.mxu1 %v1836_v14 }
 0x1e0   : > { %v928_v17 = vpop.f32.mrf.mxu0 }
 0x1e6   : > { %v977_v18 = vpop.f32.mrf.mxu1  ;;  %v958_v19 = vpop.f32.mrf.mxu3 }
 0x1e7   : > { %v978_v22 = vadd.f32 %v977_v18, %v928_v17 }
 0x1e8   : > { %v930_v20 = vpop.f32.mrf.mxu0 }
 0x1ee   : > { %v979_v21 = vpop.f32.mrf.mxu1  ;;  %v960_v25 = vpop.f32.mrf.mxu3 }
 0x1ef   : > { %v980_v23 = vadd.f32 %v979_v21, %v930_v20  ;;  %v1146_v21 = vld [vmem:[%s2930_s27 + $0x10] sm:$0xff] }
 0x1f0   : > { %v933_v26 = vpop.f32.mrf.mxu0 }
 0x1f1   : > { %v1017_v24 = vpack.c.bf16 %v980_v23, %v978_v22 }
 0x1f3   : > { %1101 = vmatmul.bf16.vlgmr.msra.gmra.mxu2 %v1017_v24 }
 0x1f6   : > { %v982_v27 = vpop.f32.mrf.mxu1  ;;  %v963_v28 = vpop.f32.mrf.mxu3 }
 0x1f7   : > { %v983_v31 = vadd.f32 %v982_v27, %v933_v26  ;;  %v1147_v26 = vld [vmem:[%s2930_s27 + $0x18] sm:$0xff] }
 0x1f8   : > { %v935_v29 = vpop.f32.mrf.mxu0 }
 0x1fe   : > { %v984_v30 = vpop.f32.mrf.mxu1  ;;  %v965_v34 = vpop.f32.mrf.mxu3 }
 0x1ff   : > { %v985_v32 = vadd.f32 %v984_v30, %v935_v29  ;;  %v1148_v30 = vld [vmem:[%s2930_s27 + $0x20] sm:$0xff] }
 0x200   : > { %v938_v35 = vpop.f32.mrf.mxu0 }
 0x201   : > { %v1018_v33 = vpack.c.bf16 %v985_v32, %v983_v31 }
 0x203   : > { %1106 = vmatmul.bf16.gmra.mxu2 %v1018_v33 }
 0x206   : > { %v987_v36 = vpop.f32.mrf.mxu1  ;;  %v1007_v37 = vpop.f32.mrf.mxu3 }
 0x207   : > { %v988_v40 = vadd.f32 %v987_v36, %v938_v35  ;;  %v1008_v44 = vadd.f32 %v1007_v37, %v958_v19  ;;  %v1156_v35 = vld [vmem:[%s2930_s27 + $0x60] sm:$0xff] }
 0x208   : > { %v940_v38 = vpop.f32.mrf.mxu0 }
 0x20e   : > { %v989_v39 = vpop.f32.mrf.mxu1  ;;  %v1009_v43 = vpop.f32.mrf.mxu3 }
 0x20f   : > { %v990_v41 = vadd.f32 %v989_v39, %v940_v38  ;;  %v1010_v45 = vadd.f32 %v1009_v43, %v960_v25 }
 0x210   : > { %v943_v46 = vpop.f32.mrf.mxu0 }
 0x211   : > { %v1019_v42 = vpack.c.bf16 %v990_v41, %v988_v40  ;;  %v1023_v47 = vpack.c.bf16 %v1010_v45, %v1008_v44  ;;  %v1149_v40 = vld [vmem:[%s2930_s27 + $0x28] sm:$0xff] }
 0x213   : > { %1111 = vmatmul.bf16.gmra.mxu2 %v1019_v42  ;;  %1131 = vmatmul.bf16.vlgmr.msra.gmra.mxu3 %v1023_v47 }
 0x216   : > { %v992_v48 = vpop.f32.mrf.mxu1  ;;  %v1012_v49 = vpop.f32.mrf.mxu3 }
 0x217   : > { %v993_v52 = vadd.f32 %v992_v48, %v943_v46  ;;  %v1013_v56 = vadd.f32 %v1012_v49, %v963_v28  ;;  %v1157_v46 = vld [vmem:[%s2930_s27 + $0x68] sm:$0xff] }
 0x218   : > { %v945_v50 = vpop.f32.mrf.mxu0 }
 0x21e   : > { %v994_v51 = vpop.f32.mrf.mxu1  ;;  %v1014_v55 = vpop.f32.mrf.mxu3 }
 0x21f   : > { %v995_v53 = vadd.f32 %v994_v51, %v945_v50  ;;  %v1015_v57 = vadd.f32 %v1014_v55, %v965_v34  ;;  %v1150_v51 = vld [vmem:[%s2930_s27 + $0x30] sm:$0xff] }
 0x220   : > { %v948_v59 = vpop.f32.mrf.mxu0  ;;  %v1158_v55 = vld [vmem:[%s2930_s27 + $0x70] sm:$0xff] }
 0x221   : > { %v1020_v54 = vpack.c.bf16 %v995_v53, %v993_v52  ;;  %v1024_v61 = vpack.c.bf16 %v1015_v57, %v1013_v56 }
 0x223   : > { %1116 = vmatmul.bf16.gmra.mxu2 %v1020_v54  ;;  %1136 = vmatmul.bf16.gmra.mxu3 %v1024_v61  ;;  %v1151_v61 = vld [vmem:[%s2930_s27 + $0x38] sm:$0xff] }
 0x226   : > { %v997_v60 = vpop.f32.mrf.mxu1 }
 0x227   : > { %v998_v0 = vadd.f32 %v997_v60, %v948_v59 }
 0x228   : > { %v950_v62 = vpop.f32.mrf.mxu0 }
 0x22e   : > { %v999_v63 = vpop.f32.mrf.mxu1 }
 0x22f   : > { %v1000_v1 = vadd.f32 %v999_v63, %v950_v62  ;;  %v1159_v63 = vld [vmem:[%s2930_s27 + $0x78] sm:$0xff] }
 0x230   : > { %v953_v3 = vpop.f32.mrf.mxu0 }
 0x231   : > { %v1021_v2 = vpack.c.bf16 %v1000_v1, %v998_v0 }
 0x233   : > { %1121 = vmatmul.bf16.gmra.mxu2 %v1021_v2 }
 0x236   : > { %v1002_v4 = vpop.f32.mrf.mxu1 }
 0x237   : > { %v1003_v7 = vadd.f32 %v1002_v4, %v953_v3 }
 0x238   : > { %v955_v5 = vpop.f32.mrf.mxu0 }
 0x23e   : > { %v1004_v6 = vpop.f32.mrf.mxu1 }
 0x23f   : > { %v1005_v8 = vadd.f32 %v1004_v6, %v955_v5  ;;  %v1152_v5 = vld [vmem:[%s2930_s27 + $0x40] sm:$0xff] }
 0x241   : > { %v1022_v9 = vpack.c.bf16 %v1005_v8, %v1003_v7 }
 0x243   : > { %1126 = vmatmul.bf16.gmra.mxu2 %v1022_v9  ;;  %v1153_v9 = vld [vmem:[%s2930_s27 + $0x48] sm:$0xff] }
 0x276   : > { %v1102_v11 = vpop.f32.mrf.mxu2 }
 0x277   : > { %v1103_v13 = vadd.f32 %v2927_v10, %v1102_v11 }
 0x279   : > { %v2934_v14 = vadd.f32 %v1144_v12, %v1103_v13 }
 0x27b   : > { %1176 = vadd.xlane.f32.xlu0 %v2934_v14  ;;  %v1208_v15 = vmul.f32 %v2934_v14, %v2934_v14 }
 0x27d   : > { %1224 = vadd.xlane.f32.xlu1 %v1208_v15 }
 0x27e   : > { %v1104_v58 = vpop.f32.mrf.mxu2 }
 0x27f   : > { %v1105_v17 = vadd.f32 %v2927_v10, %v1104_v58 }
 0x281   : > { %v2941_v18 = vadd.f32 %v1145_v16, %v1105_v17  ;;  %v1154_v16 = vld [vmem:[%s2930_s27 + $0x50] sm:$0xff] }
 0x283   : > { %1178 = vadd.xlane.f32.xlu0 %v2941_v18  ;;  %v1209_v19 = vmul.f32 %v2941_v18, %v2941_v18 }
 0x285   : > { %1226 = vadd.xlane.f32.xlu2 %v1209_v19 }
 0x286   : > { %v1107_v20 = vpop.f32.mrf.mxu2 }
 0x287   : > { %v1108_v22 = vadd.f32 %v2927_v10, %v1107_v20 }
 0x289   : > { %v2948_v23 = vadd.f32 %v1146_v21, %v1108_v22  ;;  %v1155_v22 = vld [vmem:[%s2930_s27 + $0x58] sm:$0xff]  ;;  %s1585_s27 = scalar_lea.sflag [#allocation5], %s369_s18 }
 0x28b   : > { %1180 = vadd.xlane.f32.xlu1 %v2948_v23  ;;  %v1210_v24 = vmul.f32 %v2948_v23, %v2948_v23 }
 0x28d   : > { %1228 = vadd.xlane.f32.xlu0 %v1210_v24 }
 0x28e   : > { %v1109_v25 = vpop.f32.mrf.mxu2 }
 0x28f   : > { %v1110_v27 = vadd.f32 %v2927_v10, %v1109_v25 }
 0x291   : > { %v2955_v28 = vadd.f32 %v1147_v26, %v1110_v27 }
 0x293   : > { %1182 = vadd.xlane.f32.xlu1 %v2955_v28  ;;  %v1211_v33 = vmul.f32 %v2955_v28, %v2955_v28 }
 0x296   : > { %v1112_v29 = vpop.f32.mrf.mxu2  ;;  %v1132_v34 = vpop.f32.mrf.mxu3 }
 0x297   : > { %v1113_v31 = vadd.f32 %v2927_v10, %v1112_v29  ;;  %v1133_v36 = vadd.f32 %v2927_v10, %v1132_v34 }
 0x299   : > { %v2960_v32 = vadd.f32 %v1148_v30, %v1113_v31  ;;  %v2967_v37 = vadd.f32 %v1156_v35, %v1133_v36 }
 0x29b   : > { %1184 = vadd.xlane.f32.xlu2 %v2960_v32  ;;  %1230 = vadd.xlane.f32.xlu1 %v1211_v33  ;;  %v1220_v41 = vmul.f32 %v2967_v37, %v2967_v37  ;;  %v1212_v42 = vmul.f32 %v2960_v32, %v2960_v32 }
 0x29c   : > { %1200 = vadd.xlane.f32.xlu0 %v2967_v37 }
 0x29e   : > { %v1114_v38 = vpop.f32.mrf.mxu2  ;;  %v1134_v44 = vpop.f32.mrf.mxu3 }
 0x29f   : > { %v1115_v39 = vadd.f32 %v2927_v10, %v1114_v38  ;;  %v1135_v45 = vadd.f32 %v2927_v10, %v1134_v44 }
 0x2a1   : > { %v2976_v43 = vadd.f32 %v1149_v40, %v1115_v39  ;;  %v2982_v49 = vadd.f32 %v1157_v46, %v1135_v45 }
 0x2a3   : > { %1232 = vadd.xlane.f32.xlu2 %v1212_v42  ;;  %1248 = vadd.xlane.f32.xlu1 %v1220_v41  ;;  %v1213_v48 = vmul.f32 %v2976_v43, %v2976_v43  ;;  %v1221_v29 = vmul.f32 %v2982_v49, %v2982_v49 }
 0x2a5   : > { %1234 = vadd.xlane.f32.xlu0 %v1213_v48 }
 0x2a6   : > { %v1117_v47 = vpop.f32.mrf.mxu2  ;;  %v1137_v52 = vpop.f32.mrf.mxu3 }
 0x2a7   : > { %v1118_v50 = vadd.f32 %v2927_v10, %v1117_v47  ;;  %v1138_v54 = vadd.f32 %v2927_v10, %v1137_v52 }
 0x2a9   : > { %v2988_v53 = vadd.f32 %v1150_v51, %v1118_v50  ;;  %v2993_v57 = vadd.f32 %v1158_v55, %v1138_v54 }
 0x2ab   : > { %1186 = vadd.xlane.f32.xlu2 %v2976_v43  ;;  %1202 = vadd.xlane.f32.xlu1 %v2982_v49  ;;  %v1214_v60 = vmul.f32 %v2988_v53, %v2988_v53  ;;  %v1222_v30 = vmul.f32 %v2993_v57, %v2993_v57 }
 0x2ad   : > { %1188 = vadd.xlane.f32.xlu0 %v2988_v53 }
 0x2ae   : > { %v1119_v56 = vpop.f32.mrf.mxu2  ;;  %v1139_v62 = vpop.f32.mrf.mxu3 }
 0x2af   : > { %v1120_v59 = vadd.f32 %v2927_v10, %v1119_v56  ;;  %v1140_v0 = vadd.f32 %v2927_v10, %v1139_v62 }
 0x2b1   : > { %v3002_v1 = vadd.f32 %v1151_v61, %v1120_v59  ;;  %v3004_v2 = vadd.f32 %v1159_v63, %v1140_v0 }
 0x2b3   : > { %1204 = vadd.xlane.f32.xlu2 %v2993_v57  ;;  %1236 = vadd.xlane.f32.xlu1 %v1214_v60  ;;  %v1215_v6 = vmul.f32 %v3002_v1, %v3002_v1  ;;  %v1223_v27 = vmul.f32 %v3004_v2, %v3004_v2 }
 0x2b5   : > { %1206 = vadd.xlane.f32.xlu0 %v3004_v2 }
 0x2b6   : > { %v1122_v3 = vpop.f32.mrf.mxu2 }
 0x2b7   : > { %v1123_v4 = vadd.f32 %v2927_v10, %v1122_v3 }
 0x2b9   : > { %v3011_v7 = vadd.f32 %v1152_v5, %v1123_v4 }
 0x2bb   : > { %1238 = vadd.xlane.f32.xlu2 %v1215_v6  ;;  %1190 = vadd.xlane.f32.xlu1 %v3002_v1  ;;  %v1216_v11 = vmul.f32 %v3011_v7, %v3011_v7  ;;  %v3052_v6 = vld [vmem:[%s3344_s3] ss:$0 sm:$0xff] }
 0x2bd   : > { %1240 = vadd.xlane.f32.xlu0 %v1216_v11  ;;  %v3057_v11 = vld [vmem:[%s3345_s13] ss:$0 sm:$0xff] }
 0x2be   : > { %v1124_v8 = vpop.f32.mrf.mxu2 }
 0x2bf   : > { %v1125_v12 = vadd.f32 %v2927_v10, %v1124_v8 }
 0x2c1   : > { %v3018_v13 = vadd.f32 %v1153_v9, %v1125_v12 }
 0x2c3   : > { %1192 = vadd.xlane.f32.xlu2 %v3011_v7  ;;  %v1217_v15 = vmul.f32 %v3018_v13, %v3018_v13 }
 0x2c5   : > { %1242 = vadd.xlane.f32.xlu1 %v1217_v15  ;;  %1194 = vadd.xlane.f32.xlu0 %v3018_v13 }
 0x2c6   : > { %v1127_v58 = vpop.f32.mrf.mxu2 }
 0x2c7   : > { %v1128_v17 = vadd.f32 %v2927_v10, %v1127_v58 }
 0x2c9   : > { %v3026_v19 = vadd.f32 %v1154_v16, %v1128_v17 }
 0x2cb   : > { %v1218_v20 = vmul.f32 %v3026_v19, %v3026_v19 }
 0x2cd   : > { %1244 = vadd.xlane.f32.xlu2 %v1218_v20  ;;  %1196 = vadd.xlane.f32.xlu1 %v3026_v19 }
 0x2ce   : > { %v1129_v21 = vpop.f32.mrf.mxu2 }
 0x2cf   : > { %v1130_v24 = vadd.f32 %v2927_v10, %v1129_v21 }
 0x2d1   : > { %v3033_v25 = vadd.f32 %v1155_v22, %v1130_v24 }
 0x2d3   : > { %v1219_v26 = vmul.f32 %v3033_v25, %v3033_v25 }
 0x2d5   : > { %1198 = vadd.xlane.f32.xlu2 %v3033_v25  ;;  %1246 = vadd.xlane.f32.xlu0 %v1219_v26 }
 0x2d6   : > { %1254 = vadd.xlane.f32.xlu1 %v1223_v27 }
 0x2dd   : > { %1250 = vadd.xlane.f32.xlu2 %v1221_v29  ;;  %1252 = vadd.xlane.f32.xlu0 %v1222_v30 }
 0x2ee   : > { %v1177_v10 = vpop.xlane.xlu0 %1176 }
 0x2ef   : > { %v1256_v31 = vmul.f32 0.0078125, %v1177_v10 }
 0x2f0   : > { %v1225_v33 = vpop.xlane.xlu1 %1224 }
 0x2f1   : > { %v1288_v34 = vmul.f32 %v1256_v31, %v1256_v31  ;;  %v1272_v35 = vmul.f32 0.0078125, %v1225_v33  ;;  %v1320_v5 = vsub.f32 %v2934_v14, %v1256_v31 }
 0x2f3   : > { %v1304_v36 = vsub.f32 %v1272_v35, %v1288_v34 }
 0x2f5   : > { %v1336_v38 = vadd.f32 1e-05, %v1304_v36 }
 0x2f6   : > { %v1179_v39 = vpop.xlane.xlu0 %1178 }
 0x2f7   : > { %2287 = vrsqrt.f32 %v1336_v38  ;;  %v1257_v40 = vmul.f32 0.0078125, %v1179_v39  ;;  %vm1358_vm1 = vweird.f32 %v1336_v38 }
 0x2f8   : > { %v1227_v41 = vpop.xlane.xlu2 %1226 }
 0x2f9   : > { %v1289_v42 = vmul.f32 %v1257_v40, %v1257_v40  ;;  %v1273_v44 = vmul.f32 0.0078125, %v1227_v41  ;;  %v1321_v27 = vsub.f32 %v2941_v18, %v1257_v40 }
 0x2fb   : > { %v1305_v45 = vsub.f32 %v1273_v44, %v1289_v42 }
 0x2fd   : > { %v2288_v46 = vpop.eup %2287  ;;  %v1337_v47 = vadd.f32 1e-05, %v1305_v45 }
 0x2fe   : > { %v1353_v48 = vmul.f32 %v2288_v46, %v1336_v38  ;;  %v1181_v50 = vpop.xlane.xlu1 %1180  ;;  %vm1359_vm0 = vweird.f32 %v2288_v46 }
 0x2ff   : > { %2289 = vrsqrt.f32 %v1337_v47  ;;  %v3044_v51 = vmul.f32 0.0078125, %v1181_v50  ;;  %vm1360_vm2 = vmor %vm1358_vm1, %vm1359_vm0  ;;  %vm1368_vm4 = vweird.f32 %v1337_v47 }
 0x300   : > { %v1354_v52 = vmul.f32 %v2288_v46, %v1353_v48  ;;  %v1229_v54 = vpop.xlane.xlu0 %1228 }
 0x301   : > { %v1290_v55 = vmul.f32 %v3044_v51, %v3044_v51  ;;  %v1274_v56 = vmul.f32 0.0078125, %v1229_v54  ;;  %v1322_v48 = vsub.f32 %v2948_v23, %v3044_v51 }
 0x302   : > { %v1355_v59 = vmul.f32 0.5, %v1354_v52 }
 0x303   : > { %v1306_v60 = vsub.f32 %v1274_v56, %v1290_v55 }
 0x304   : > { %v1356_v61 = vsub.f32 1.5, %v1355_v59 }
 0x305   : > { %v2290_v62 = vpop.eup %2289  ;;  %v1338_v63 = vadd.f32 1e-05, %v1306_v60 }
 0x306   : > { %v1357_v0 = vmul.f32 %v2288_v46, %v1356_v61  ;;  %v1363_v3 = vmul.f32 %v2290_v62, %v1337_v47  ;;  %v1183_v4 = vpop.xlane.xlu1 %1182  ;;  %vm1369_vm3 = vweird.f32 %v2290_v62 }
 0x307   : > { %2291 = vrsqrt.f32 %v1338_v63  ;;  %v3060_v14 = vmul.f32 0.0078125, %v1183_v4  ;;  %vm1370_vm5 = vmor %vm1368_vm4, %vm1369_vm3  ;;  %vm1378_vm7 = vweird.f32 %v1338_v63 }
 0x308   : > { %v1361_v8 = vsel %vm1360_vm2, %v2288_v46, %v1357_v0  ;;  %v1364_v9 = vmul.f32 %v2290_v62, %v1363_v3 }
 0x309   : > { %v1512_v12 = vmul.f32 %v1361_v8, %v1320_v5  ;;  %v1291_v29 = vmul.f32 %v3060_v14, %v3060_v14 }
 0x30a   : > { %v1365_v15 = vmul.f32 0.5, %v1364_v9 }
 0x30b   : > { %v1532_v58 = vmul.f32 %v3052_v6, %v1512_v12 }
 0x30c   : > { %v1366_v16 = vsub.f32 1.5, %v1365_v15 }
 0x30d   : > { %v2292_v17 = vpop.eup %2291  ;;  %v1552_v20 = vadd.f32 %v3057_v11, %v1532_v58 }
 0x30e   : > { %v1367_v21 = vmul.f32 %v2290_v62, %v1366_v16  ;;  %v1373_v22 = vmul.f32 %v2292_v17, %v1338_v63  ;;  %v1185_v24 = vpop.xlane.xlu2 %1184  ;;  %v1231_v26 = vpop.xlane.xlu1 %1230  ;;  %vm1379_vm6 = vweird.f32 %v2292_v17 }
 0x30f   : > { %1568 = vst [vmem:[%s2819_s17] sm:$0xff] %v1552_v20  ;;  %v1275_v30 = vmul.f32 0.0078125, %v1231_v26  ;;  %v3068_v38 = vmul.f32 0.0078125, %v1185_v24  ;;  %v1201_v41 = vpop.xlane.xlu0 %1200  ;;  %vm1380_vm8 = vmor %vm1378_vm7, %vm1379_vm6 }
 0x310   : > { %v1371_v10 = vsel %vm1370_vm5, %v2290_v62, %v1367_v21  ;;  %v1374_v31 = vmul.f32 %v2292_v17, %v1373_v22  ;;  %v3070_v18 = vmul.f32 0.0078125, %v1201_v41 }
 0x311   : > { %v1513_v33 = vmul.f32 %v1371_v10, %v1321_v27  ;;  %v1307_v34 = vsub.f32 %v1275_v30, %v1291_v29  ;;  %v1292_v50 = vmul.f32 %v3068_v38, %v3068_v38  ;;  %v1323_v29 = vsub.f32 %v2955_v28, %v3060_v14 }
 0x312   : > { %v1375_v35 = vmul.f32 0.5, %v1374_v31  ;;  %v1300_v45 = vmul.f32 %v3070_v18, %v3070_v18 }
 0x313   : > { %v1533_v36 = vmul.f32 %v3052_v6, %v1513_v33  ;;  %v1339_v39 = vadd.f32 1e-05, %v1307_v34 }
 0x314   : > { %v1376_v42 = vsub.f32 1.5, %v1375_v35 }
 0x315   : > { %v1553_v40 = vadd.f32 %v3057_v11, %v1533_v36  ;;  %2293 = vrsqrt.f32 %v1339_v39  ;;  %vm1388_vm10 = vweird.f32 %v1339_v39 }
 0x316   : > { %v1377_v44 = vmul.f32 %v2292_v17, %v1376_v42  ;;  %v1233_v46 = vpop.xlane.xlu2 %1232  ;;  %v1249_v47 = vpop.xlane.xlu1 %1248 }
 0x317   : > { %1569 = vst [vmem:[%s2819_s17 + $0x8] sm:$0xff] %v1553_v40  ;;  %v1276_v52 = vmul.f32 0.0078125, %v1233_v46  ;;  %v1284_v54 = vmul.f32 0.0078125, %v1249_v47 }
 0x318   : > { %v1381_v55 = vsel %vm1380_vm8, %v2292_v17, %v1377_v44  ;;  %v1235_v3 = vpop.xlane.xlu0 %1234 }
 0x319   : > { %v1514_v56 = vmul.f32 %v1381_v55, %v1322_v48  ;;  %v1308_v59 = vsub.f32 %v1276_v52, %v1292_v50  ;;  %v1316_v60 = vsub.f32 %v1284_v54, %v1300_v45  ;;  %v1277_v15 = vmul.f32 0.0078125, %v1235_v3 }
 0x31a   : > { %v1324_v55 = vsub.f32 %v2960_v32, %v3068_v38 }
 0x31b   : > { %v2294_v61 = vpop.eup %2293  ;;  %v1534_v62 = vmul.f32 %v3052_v6, %v1514_v56  ;;  %v1340_v63 = vadd.f32 1e-05, %v1308_v59  ;;  %v1348_v0 = vadd.f32 1e-05, %v1316_v60  ;;  %v1332_v59 = vsub.f32 %v2967_v37, %v3070_v18 }
 0x31c   : > { %v1383_v4 = vmul.f32 %v2294_v61, %v1339_v39  ;;  %vm1389_vm9 = vweird.f32 %v2294_v61 }
 0x31d   : > { %v1554_v23 = vadd.f32 %v3057_v11, %v1534_v62  ;;  %2295 = vrsqrt.f32 %v1340_v63  ;;  %vm1390_vm11 = vmor %vm1388_vm10, %vm1389_vm9  ;;  %vm1398_vm14 = vweird.f32 %v1340_v63  ;;  %vm1478_vm0 = vweird.f32 %v1348_v0 }
 0x31e   : > { %v1384_v51 = vmul.f32 %v2294_v61, %v1383_v4  ;;  %2297 = vrsqrt.f32 %v1348_v0  ;;  %v1187_v5 = vpop.xlane.xlu2 %1186  ;;  %v3082_v8 = vpop.xlane.xlu1 %1202 }
 0x31f   : > { %1570 = vst [vmem:[%s2819_s17 + $0x10] sm:$0xff] %v1554_v23  ;;  %v3085_v9 = vmul.f32 0.0078125, %v1187_v5 }
 0x320   : > { %v1385_v12 = vmul.f32 0.5, %v1384_v51  ;;  %v1189_v21 = vpop.xlane.xlu0 %1188 }
 0x321   : > { %v1293_v58 = vmul.f32 %v3085_v9, %v3085_v9  ;;  %v3089_v27 = vmul.f32 0.0078125, %v1189_v21 }
 0x322   : > { %v1386_v16 = vsub.f32 1.5, %v1385_v12 }
 0x323   : > { %v2296_v17 = vpop.eup %2295  ;;  %v1309_v20 = vsub.f32 %v1277_v15, %v1293_v58  ;;  %v1294_v34 = vmul.f32 %v3089_v27, %v3089_v27 }
 0x324   : > { %v2298_v22 = vpop.eup %2297  ;;  %v1387_v24 = vmul.f32 %v2294_v61, %v1386_v16  ;;  %v1393_v26 = vmul.f32 %v2296_v17, %v1340_v63  ;;  %vm1399_vm12 = vweird.f32 %v2296_v17 }
 0x325   : > { %v1473_v30 = vmul.f32 %v2298_v22, %v1348_v0  ;;  %v1341_v10 = vadd.f32 1e-05, %v1309_v20  ;;  %vm1479_vm13 = vweird.f32 %v2298_v22  ;;  %vm1400_vm15 = vmor %vm1398_vm14, %vm1399_vm12 }
 0x326   : > { %v1391_v31 = vsel %vm1390_vm11, %v2294_v61, %v1387_v24  ;;  %v1394_v33 = vmul.f32 %v2296_v17, %v1393_v26  ;;  %v3095_v35 = vpop.xlane.xlu2 %1204  ;;  %v1237_v36 = vpop.xlane.xlu1 %1236  ;;  %vm1480_vm1 = vmor %vm1478_vm0, %vm1479_vm13  ;;  %v1325_v26 = vsub.f32 %v2976_v43, %v3085_v9 }
 0x327   : > { %v1515_v41 = vmul.f32 %v1391_v31, %v1323_v29  ;;  %v1474_v42 = vmul.f32 %v2298_v22, %v1473_v30  ;;  %2299 = vrsqrt.f32 %v1341_v10  ;;  %v1278_v40 = vmul.f32 0.0078125, %v1237_v36 }
 0x328   : > { %v1395_v39 = vmul.f32 0.5, %v1394_v33  ;;  %v3099_v48 = vpop.xlane.xlu0 %1206  ;;  %vm1408_vm3 = vweird.f32 %v1341_v10 }
 0x329   : > { %v1535_v44 = vmul.f32 %v3052_v6, %v1515_v41  ;;  %v1475_v28 = vmul.f32 0.5, %v1474_v42  ;;  %v1310_v45 = vsub.f32 %v1278_v40, %v1294_v34 }
 0x32a   : > { %v1396_v14 = vsub.f32 1.5, %v1395_v39 }
 0x32b   : > { %v1555_v46 = vadd.f32 %v3057_v11, %v1535_v44  ;;  %v1476_v47 = vsub.f32 1.5, %v1475_v28  ;;  %v1342_v52 = vadd.f32 1e-05, %v1310_v45  ;;  %v1326_v45 = vsub.f32 %v2988_v53, %v3089_v27 }
 0x32c   : > { %v1397_v50 = vmul.f32 %v2296_v17, %v1396_v14 }
 0x32d   : > { %v2300_v54 = vpop.eup %2299  ;;  %1571 = vst [vmem:[%s2819_s17 + $0x18] sm:$0xff] %v1555_v46  ;;  %v1477_v56 = vmul.f32 %v2298_v22, %v1476_v47  ;;  %2301 = vrsqrt.f32 %v1342_v52  ;;  %vm1418_vm6 = vweird.f32 %v1342_v52 }
 0x32e   : > { %v1401_v60 = vsel %vm1400_vm15, %v2296_v17, %v1397_v50  ;;  %v1403_v61 = vmul.f32 %v2300_v54, %v1341_v10  ;;  %v1239_v62 = vpop.xlane.xlu2 %1238  ;;  %v1191_v3 = vpop.xlane.xlu1 %1190  ;;  %vm1409_vm2 = vweird.f32 %v2300_v54 }
 0x32f   : > { %v1516_v4 = vmul.f32 %v1401_v60, %v1324_v55  ;;  %v1481_v63 = vsel %vm1480_vm1, %v2298_v22, %v1477_v56  ;;  %v3107_v38 = vmul.f32 0.0078125, %v1191_v3  ;;  %v1279_v18 = vmul.f32 0.0078125, %v1239_v62  ;;  %vm1410_vm4 = vmor %vm1408_vm3, %vm1409_vm2 }
 0x330   : > { %v1524_v23 = vmul.f32 %v1481_v63, %v1332_v59  ;;  %v1404_v51 = vmul.f32 %v2300_v54, %v1403_v61  ;;  %v1241_v15 = vpop.xlane.xlu0 %1240 }
 0x331   : > { %v1536_v32 = vmul.f32 %v3052_v6, %v1516_v4  ;;  %v1295_v12 = vmul.f32 %v3107_v38, %v3107_v38  ;;  %v1280_v42 = vmul.f32 0.0078125, %v1241_v15 }
 0x332   : > { %v1544_v0 = vmul.f32 %v3052_v6, %v1524_v23  ;;  %v1405_v5 = vmul.f32 0.5, %v1404_v51 }
 0x333   : > { %v1556_v37 = vadd.f32 %v3057_v11, %v1536_v32  ;;  %v2302_v58 = vpop.eup %2301  ;;  %v1311_v21 = vsub.f32 %v1279_v18, %v1295_v12 }
 0x334   : > { %v1564_v16 = vadd.f32 %v3057_v11, %v1544_v0  ;;  %v1406_v17 = vsub.f32 1.5, %v1405_v5  ;;  %v1413_v20 = vmul.f32 %v2302_v58, %v1342_v52  ;;  %vm1419_vm5 = vweird.f32 %v2302_v58 }
 0x335   : > { %1572 = vst [vmem:[%s2819_s17 + $0x20] sm:$0xff] %v1556_v37  ;;  %v1343_v30 = vadd.f32 1e-05, %v1311_v21  ;;  %vm1420_vm7 = vmor %vm1418_vm6, %vm1419_vm5  ;;  %v3145_v5 = vmul.f32 0.0078125, %v3099_v48 }
 0x336   : > { %1580 = vst [vmem:[%s2819_s17 + $0x60] sm:$0xff] %v1564_v16  ;;  %v1407_v22 = vmul.f32 %v2300_v54, %v1406_v17  ;;  %v1193_v24 = vpop.xlane.xlu2 %1192  ;;  %v1414_v29 = vmul.f32 %v2302_v58, %v1413_v20  ;;  %v1327_v17 = vsub.f32 %v3002_v1, %v3107_v38  ;;  %v3160_v1 = vmul.f32 0.0078125, %v3082_v8 }
 0x337   : > { %v3118_v31 = vmul.f32 0.0078125, %v1193_v24  ;;  %2303 = vrsqrt.f32 %v1343_v30  ;;  %vm1428_vm9 = vweird.f32 %v1343_v30 }
 0x338   : > { %v1411_v33 = vsel %vm1410_vm4, %v2300_v54, %v1407_v22  ;;  %v1243_v34 = vpop.xlane.xlu1 %1242  ;;  %v1415_v41 = vmul.f32 0.5, %v1414_v29  ;;  %v1195_v43 = vpop.xlane.xlu0 %1194  ;;  %v1303_v22 = vmul.f32 %v3145_v5, %v3145_v5 }
 0x339   : > { %v1517_v36 = vmul.f32 %v1411_v33, %v1325_v26  ;;  %v1296_v39 = vmul.f32 %v3118_v31, %v3118_v31  ;;  %v3123_v44 = vmul.f32 0.0078125, %v1195_v43  ;;  %v1281_v55 = vmul.f32 0.0078125, %v1243_v34 }
 0x33a   : > { %v1416_v40 = vsub.f32 1.5, %v1415_v41 }
 0x33b   : > { %v1537_v10 = vmul.f32 %v3052_v6, %v1517_v36  ;;  %v1312_v9 = vsub.f32 %v1280_v42, %v1296_v39  ;;  %v1297_v47 = vmul.f32 %v3123_v44, %v3123_v44 }
 0x33c   : > { %v1417_v14 = vmul.f32 %v2302_v58, %v1416_v40  ;;  %v3165_v40 = vmul.f32 0.0078125, %v3095_v35 }
 0x33d   : > { %v1557_v28 = vadd.f32 %v3057_v11, %v1537_v10  ;;  %v3128_v46 = vadd.f32 1e-05, %v1312_v9  ;;  %v2304_v50 = vpop.eup %2303  ;;  %v1313_v61 = vsub.f32 %v1281_v55, %v1297_v47  ;;  %v1328_v47 = vsub.f32 %v3011_v7, %v3118_v31 }
 0x33e   : > { %v1421_v54 = vsel %vm1420_vm7, %v2302_v58, %v1417_v14  ;;  %v1423_v59 = vmul.f32 %v2304_v50, %v1343_v30  ;;  %vm1429_vm8 = vweird.f32 %v2304_v50  ;;  %v1302_v31 = vmul.f32 %v3165_v40, %v3165_v40 }
 0x33f   : > { %1573 = vst [vmem:[%s2819_s17 + $0x28] sm:$0xff] %v1557_v28  ;;  %v1518_v56 = vmul.f32 %v1421_v54, %v1326_v45  ;;  %2305 = vrsqrt.f32 %v3128_v46  ;;  %v3137_v3 = vadd.f32 1e-05, %v1313_v61  ;;  %vm1430_vm10 = vmor %vm1428_vm9, %vm1429_vm8  ;;  %vm1438_vm12 = vweird.f32 %v3128_v46 }
 0x340   : > { %v1245_v60 = vpop.xlane.xlu2 %1244  ;;  %v1197_v52 = vpop.xlane.xlu1 %1196  ;;  %v1424_v27 = vmul.f32 %v2304_v50, %v1423_v59 }
 0x341   : > { %v3134_v62 = vmul.f32 0.0078125, %v1197_v52  ;;  %v1538_v53 = vmul.f32 %v3052_v6, %v1518_v56  ;;  %v1282_v4 = vmul.f32 0.0078125, %v1245_v60  ;;  %2307 = vrsqrt.f32 %v3137_v3 }
 0x342   : > { %v1425_v51 = vmul.f32 0.5, %v1424_v27  ;;  %v1301_v56 = vmul.f32 %v3160_v1, %v3160_v1  ;;  %vm1448_vm15 = vweird.f32 %v3137_v3 }
 0x343   : > { %v1298_v63 = vmul.f32 %v3134_v62, %v3134_v62  ;;  %v1558_v23 = vadd.f32 %v3057_v11, %v1538_v53 }
 0x344   : > { %v1426_v37 = vsub.f32 1.5, %v1425_v51 }
 0x345   : > { %v1314_v32 = vsub.f32 %v1282_v4, %v1298_v63  ;;  %v2306_v0 = vpop.eup %2305  ;;  %1574 = vst [vmem:[%s2819_s17 + $0x30] sm:$0xff] %v1558_v23  ;;  %v1329_v23 = vsub.f32 %v3018_v13, %v3123_v44 }
 0x346   : > { %v1433_v18 = vmul.f32 %v2306_v0, %v3128_v46  ;;  %v1427_v15 = vmul.f32 %v2304_v50, %v1426_v37  ;;  %vm1439_vm11 = vweird.f32 %v2306_v0 }
 0x347   : > { %v3148_v12 = vadd.f32 1e-05, %v1314_v32  ;;  %v2308_v29 = vpop.eup %2307  ;;  %vm1440_vm13 = vmor %vm1438_vm12, %vm1439_vm11 }
 0x348   : > { %v1199_v58 = vpop.xlane.xlu2 %1198  ;;  %v1247_v16 = vpop.xlane.xlu0 %1246  ;;  %v1434_v20 = vmul.f32 %v2306_v0, %v1433_v18  ;;  %v1431_v24 = vsel %vm1430_vm10, %v2304_v50, %v1427_v15  ;;  %v1443_v38 = vmul.f32 %v2308_v29, %v3137_v3  ;;  %vm1449_vm14 = vweird.f32 %v2308_v29 }
 0x349   : > { %2309 = vrsqrt.f32 %v3148_v12  ;;  %v3153_v21 = vmul.f32 0.0078125, %v1199_v58  ;;  %v1255_v48 = vpop.xlane.xlu1 %1254  ;;  %v1519_v33 = vmul.f32 %v1431_v24, %v1327_v17  ;;  %v1283_v36 = vmul.f32 0.0078125, %v1247_v16  ;;  %vm1450_vm0 = vmor %vm1448_vm15, %vm1449_vm14 }
 0x34a   : > { %v1287_v26 = vmul.f32 0.0078125, %v1255_v48  ;;  %v1435_v30 = vmul.f32 0.5, %v1434_v20  ;;  %v1444_v43 = vmul.f32 %v2308_v29, %v1443_v38  ;;  %vm1458_vm2 = vweird.f32 %v3148_v12 }
 0x34b   : > { %v1299_v34 = vmul.f32 %v3153_v21, %v3153_v21  ;;  %v1539_v42 = vmul.f32 %v3052_v6, %v1519_v33  ;;  %v1330_v48 = vsub.f32 %v3026_v19, %v3134_v62 }
 0x34c   : > { %v1319_v41 = vsub.f32 %v1287_v26, %v1303_v22  ;;  %v1436_v39 = vsub.f32 1.5, %v1435_v30  ;;  %v1445_v50 = vmul.f32 0.5, %v1444_v43 }
 0x34d   : > { %v1315_v10 = vsub.f32 %v1283_v36, %v1299_v34  ;;  %v1559_v14 = vadd.f32 %v3057_v11, %v1539_v42 }
 0x34e   : > { %v3167_v9 = vadd.f32 1e-05, %v1319_v41  ;;  %v1437_v8 = vmul.f32 %v2306_v0, %v1436_v39  ;;  %v1446_v60 = vsub.f32 1.5, %v1445_v50 }
 0x34f   : > { %v2310_v28 = vpop.eup %2309  ;;  %v3171_v45 = vadd.f32 1e-05, %v1315_v10  ;;  %1575 = vst [vmem:[%s2819_s17 + $0x38] sm:$0xff] %v1559_v14  ;;  %v1335_v10 = vsub.f32 %v3004_v2, %v3145_v5  ;;  %v1331_v14 = vsub.f32 %v3033_v25, %v3153_v21 }
 0x350   : > { %v1453_v35 = vmul.f32 %v2310_v28, %v3148_v12  ;;  %2311 = vrsqrt.f32 %v3167_v9  ;;  %v1251_v54 = vpop.xlane.xlu2 %1250  ;;  %v1253_v55 = vpop.xlane.xlu0 %1252  ;;  %v1441_v59 = vsel %vm1440_vm13, %v2306_v0, %v1437_v8  ;;  %v1447_v27 = vmul.f32 %v2308_v29, %v1446_v60 }
 0x351   : > { %2313 = vrsqrt.f32 %v3171_v45  ;;  %v1520_v46 = vmul.f32 %v1441_v59, %v1328_v47  ;;  %v1285_v7 = vmul.f32 0.0078125, %v1251_v54  ;;  %v1286_v61 = vmul.f32 0.0078125, %v1253_v55 }
 0x352   : > { %v1454_v52 = vmul.f32 %v2310_v28, %v1453_v35  ;;  %vm1459_vm1 = vweird.f32 %v2310_v28  ;;  %v1451_v37 = vsel %vm1450_vm0, %v2308_v29, %v1447_v27  ;;  %vm1508_vm6 = vweird.f32 %v3167_v9 }
 0x353   : > { %v1540_v53 = vmul.f32 %v3052_v6, %v1520_v46  ;;  %v1317_v63 = vsub.f32 %v1285_v7, %v1301_v56  ;;  %v1318_v51 = vsub.f32 %v1286_v61, %v1302_v31  ;;  %v1521_v58 = vmul.f32 %v1451_v37, %v1329_v23  ;;  %vm1460_vm3 = vmor %vm1458_vm2, %vm1459_vm1 }
 0x354   : > { %v1455_v4 = vmul.f32 0.5, %v1454_v52  ;;  %vm1468_vm7 = vweird.f32 %v3171_v45  ;;  %v1333_v60 = vsub.f32 %v2982_v49, %v3160_v1  ;;  %v1334_v7 = vsub.f32 %v2993_v57, %v3165_v40 }
 0x355   : > { %v1560_v0 = vadd.f32 %v3057_v11, %v1540_v53  ;;  %v3188_v15 = vadd.f32 1e-05, %v1317_v63  ;;  %v3191_v17 = vadd.f32 1e-05, %v1318_v51  ;;  %v1541_v44 = vmul.f32 %v3052_v6, %v1521_v58 }
 0x356   : > { %v2312_v32 = vpop.eup %2311  ;;  %v1456_v18 = vsub.f32 1.5, %v1455_v4 }
 0x357   : > { %v2314_v3 = vpop.eup %2313  ;;  %v1503_v16 = vmul.f32 %v2312_v32, %v3167_v9  ;;  %1576 = vst [vmem:[%s2819_s17 + $0x40] sm:$0xff] %v1560_v0  ;;  %2315 = vrsqrt.f32 %v3188_v15  ;;  %v1561_v29 = vadd.f32 %v3057_v11, %v1541_v44  ;;  %vm1509_vm4 = vweird.f32 %v2312_v32 }
 0x358   : > { %v1457_v20 = vmul.f32 %v2310_v28, %v1456_v18  ;;  %v1463_v13 = vmul.f32 %v2314_v3, %v3171_v45  ;;  %2317 = vrsqrt.f32 %v3191_v17  ;;  %vm1469_vm5 = vweird.f32 %v2314_v3  ;;  %vm1510_vm8 = vmor %vm1508_vm6, %vm1509_vm4 }
 0x359   : > { %v1504_v22 = vmul.f32 %v2312_v32, %v1503_v16  ;;  %1577 = vst [vmem:[%s2819_s17 + $0x48] sm:$0xff] %v1561_v29  ;;  %vm1470_vm9 = vmor %vm1468_vm7, %vm1469_vm5  ;;  %vm1488_vm12 = vweird.f32 %v3188_v15  ;;  %vm1498_vm14 = vweird.f32 %v3191_v17 }
 0x35a   : > { %v1461_v24 = vsel %vm1460_vm3, %v2310_v28, %v1457_v20  ;;  %v1464_v26 = vmul.f32 %v2314_v3, %v1463_v13 }
 0x35b   : > { %v1522_v12 = vmul.f32 %v1461_v24, %v1330_v48  ;;  %v1505_v33 = vmul.f32 0.5, %v1504_v22 }
 0x35c   : > { %v1465_v30 = vmul.f32 0.5, %v1464_v26 }
 0x35d   : > { %v1542_v34 = vmul.f32 %v3052_v6, %v1522_v12  ;;  %v1506_v36 = vsub.f32 1.5, %v1505_v33  ;;  %v2316_v19 = vpop.eup %2315 }
 0x35e   : > { %v1466_v62 = vsub.f32 1.5, %v1465_v30  ;;  %v2318_v38 = vpop.eup %2317  ;;  %v1483_v39 = vmul.f32 %v2316_v19, %v3188_v15  ;;  %vm1489_vm10 = vweird.f32 %v2316_v19 }
 0x35f   : > { %v1562_v41 = vadd.f32 %v3057_v11, %v1542_v34  ;;  %v1507_v42 = vmul.f32 %v2312_v32, %v1506_v36  ;;  %v1493_v28 = vmul.f32 %v2318_v38, %v3191_v17  ;;  %vm1499_vm11 = vweird.f32 %v2318_v38  ;;  %vm1490_vm13 = vmor %vm1488_vm12, %vm1489_vm10 }
 0x360   : > { %v1467_v43 = vmul.f32 %v2314_v3, %v1466_v62  ;;  %v1484_v8 = vmul.f32 %v2316_v19, %v1483_v39  ;;  %vm1500_vm15 = vmor %vm1498_vm14, %vm1499_vm11 }
 0x361   : > { %1578 = vst [vmem:[%s2819_s17 + $0x50] sm:$0xff] %v1562_v41  ;;  %v1511_v9 = vsel %vm1510_vm8, %v2312_v32, %v1507_v42  ;;  %v1494_v35 = vmul.f32 %v2318_v38, %v1493_v28 }
 0x362   : > { %v1471_v47 = vsel %vm1470_vm9, %v2314_v3, %v1467_v43  ;;  %v1527_v50 = vmul.f32 %v1511_v9, %v1335_v10  ;;  %v1485_v5 = vmul.f32 0.5, %v1484_v8 }
 0x363   : > { %v1523_v2 = vmul.f32 %v1471_v47, %v1331_v14  ;;  %v1495_v54 = vmul.f32 0.5, %v1494_v35 }
 0x364   : > { %v1547_v45 = vmul.f32 %v3052_v6, %v1527_v50  ;;  %v1486_v56 = vsub.f32 1.5, %v1485_v5 }
 0x365   : > { %v1543_v55 = vmul.f32 %v3052_v6, %v1523_v2  ;;  %v1496_v21 = vsub.f32 1.5, %v1495_v54 }
 0x366   : > { %v1567_v25 = vadd.f32 %v3057_v11, %v1547_v45  ;;  %v1487_v46 = vmul.f32 %v2316_v19, %v1486_v56 }
 0x367   : > { %v1563_v59 = vadd.f32 %v3057_v11, %v1543_v55  ;;  %v1497_v52 = vmul.f32 %v2318_v38, %v1496_v21 }
 0x368   : > { %1583 = vst [vmem:[%s2819_s17 + $0x78] sm:$0xff] %v1567_v25  ;;  %v1491_v31 = vsel %vm1490_vm13, %v2316_v19, %v1487_v46 }
 0x369   : > { %1579 = vst [vmem:[%s2819_s17 + $0x58] sm:$0xff] %v1563_v59  ;;  %v1525_v61 = vmul.f32 %v1491_v31, %v1333_v60  ;;  %v1501_v49 = vsel %vm1500_vm15, %v2318_v38, %v1497_v52 }
 0x36a   : > { %v1526_v1 = vmul.f32 %v1501_v49, %v1334_v7 }
 0x36b   : > { %v1545_v53 = vmul.f32 %v3052_v6, %v1525_v61 }
 0x36c   : > { %v1546_v27 = vmul.f32 %v3052_v6, %v1526_v1 }
 0x36d   : > { %v1565_v4 = vadd.f32 %v3057_v11, %v1545_v53 }
 0x36e   : > { %v1566_v57 = vadd.f32 %v3057_v11, %v1546_v27 }
 0x36f   : > { %1581 = vst [vmem:[%s2819_s17 + $0x68] sm:$0xff] %v1565_v4 }
 0x370   : > { %1582 = vst [vmem:[%s2819_s17 + $0x70] sm:$0xff] %v1566_v57 }
 0x371   : > { %2466 = shalt.err (!%p2463_p11)
}
 0x372   : > { %s2581_s18 = smov 128   ;;  %s2582_s17 = smov 8  }
 0x373   : > { %2161 = dma.vmem_to_hbm [thread:$0]  (%p2764_p3), %s1600_s0, 2048, %s1602_s4, %s1585_s27, %s2581_s18, %s2581_s18, %s2582_s17  }
 0x374 PF: > { %s3349_s2 = sld [smem:[#allocation17_spill]]  ;;  %p2186_p13 = scmp.ge.s32.totalorder %s2573_s15, 2 }
 0x376   : > { %p2178_p7 = pnand %p2186_p13, %p2698_p6 }
 0x378   : > { %p2179_p12 = pneg %p2178_p7 }
 0x37a   : > { %s1616_s30 = sand.u32 1, %s3349_s2  }
 0x37b   : > { %s1617_s16 = scalar_lea.sflag [#allocation5], %s1616_s30 }
 0x37c   : > { %2528 = dma.done.wait (%p2179_p12), %s1617_s16, 2048  }
 0x37d   : > { %2530 = vsyncadd (%p2179_p12), %s1617_s16, 4294965248  ;;  %s28_s15 = sadd.s32 1, %s2573_s15   ;;  %s3351_s11 = sld [smem:[#allocation20_spill]] }
 0x37e   : > { %p25_p2 = scmp.ge.s32.totalorder %s28_s15, 6   ;;  %s3352_s13 = sld [smem:[#allocation23_spill]] }
 0x37f   : > { %s3353_s27 = smov %s2537_s28  ;;  %s3354_s28 = smov %s2541_s29 }
 0x380   : > { %s3355_s29 = smov %s2780_s6  ;;  %s3356_s30 = smov %s2549_s9 }
 0x381   : > { %s3357_s9 = smov %s2553_s10  ;;  %s3358_s10 = smov %s2777_s7 }
 0x382   : > { %s3359_s12 = smov %s2569_s14  ;;  %s3360_s14 = smov %s3366_s26 }
 0x383   :  { %27 = sbr.rel (!%p25_p2) target bundleno = 21 (0x15), region = 123 }
 0x388   :  { %1623 = vsyncpa [#allocation4], 1 }
 0x389   :  { %1625 = vsyncpa [#allocation4 + $0x1], 1 }
 0x38a   :  { %1626 = vsyncpa [#allocation7], 1 }
 0x38b   :  { %1628 = vsyncpa [#allocation7 + $0x1], 1 }
 0x38c   :  { %1629 = vsyncpa [#allocation10], 1 }
 0x38d   :  { %1630 = vsyncpa [#allocation5], 1 }
 0x38e   :  { %1632 = vsyncpa [#allocation5 + $0x1], 1 }

</bundles_post_ra>
